<compile_context>
chip_gen: v5e
topology: v5e:2x2
jax: 0.10.0
libtpu: 0.0.40
codegen_flags: <defaults>
</compile_context>

<pallas_src>
import jax
import jax.numpy as jnp
from jax.experimental import pallas as pl
from jax.experimental.pallas import tpu as pltpu


def mlp_kernel(x_ref, w1_ref, b1_ref, w2_ref, b2_ref, o_ref):
    # bf16 MXU feed with f32 accumulation.  The cast is a no-op if x already
    # arrived as bf16 (padded path).
    x = x_ref[...].astype(jnp.bfloat16)
    h = jnp.dot(x, w1_ref[...], preferred_element_type=jnp.float32)
    h = jnp.maximum(h + b1_ref[...], 0.0)          # bias (f32) + ReLU(inplace=True)
    # Dropout(0.5): identity in eval/inference mode.
    h = h.astype(w2_ref.dtype)                     # back to bf16 for the second MXU matmul
    o = jnp.dot(h, w2_ref[...], preferred_element_type=jnp.float32)
    o_ref[...] = (o + b2_ref[...]).astype(o_ref.dtype)


def _round_up(x, m):
    return ((x + m - 1) // m) * m


def _cdiv(a, b):
    return -(-a // b)


def _choose_row_tiling(B, tm):
    """Pick (n_tiles, tile_rows, padded_rows).

    * 16-row granularity (bf16 packs 16 rows per sublane-packed vreg).
    * Medium batches are split into >= 2 tiles so the "parallel" grid axis can
      engage both TensorCores on v7x.
    * Tile rows are derived from cdiv(B, n_tiles) so batch-padding waste stays
      bounded instead of rounding B up to a full fixed-size tile.
    """
    grain = 16
    if B <= tm:
        n_tiles = 2 if B >= 64 else 1
    else:
        n_tiles = _cdiv(B, tm)
    tile_rows = _round_up(_cdiv(B, n_tiles), grain)
    return n_tiles, tile_rows, n_tiles * tile_rows


def prepare_classifier_params(w1, b1, w2, b2):
    """One-time (hoisted out of the forward) bf16 cast + lane-alignment padding.

    w1: (dim, hidden) f32, b1: (1, hidden), w2: (hidden, classes), b2: (1, classes).
    Returns a dict of padded device arrays to pass to classifier_forward.
    """
    dim, hidden = w1.shape
    classes = w2.shape[1]
    b1 = jnp.reshape(b1, (1, hidden))
    b2 = jnp.reshape(b2, (1, classes))

    dim_p = _round_up(dim, 128)
    hid_p = _round_up(hidden, 128)      # 1000 -> 1024
    cls_p = _round_up(classes, 128)     # lane-dense output stores

    w1_p = jnp.zeros((dim_p, hid_p), jnp.bfloat16).at[:dim, :hidden].set(w1.astype(jnp.bfloat16))
    b1_p = jnp.zeros((1, hid_p), jnp.float32).at[:, :hidden].set(b1.astype(jnp.float32))
    w2_p = jnp.zeros((hid_p, cls_p), jnp.bfloat16).at[:hidden, :classes].set(w2.astype(jnp.bfloat16))
    b2_p = jnp.zeros((1, cls_p), jnp.float32).at[:, :classes].set(b2.astype(jnp.float32))

    return dict(w1=w1_p, b1=b1_p, w2=w2_p, b2=b2_p,
                dim=dim, hidden=hidden, classes=classes)


def classifier_forward(x, params, *, tm=512):
    """x: (B, dim) f32 -> (B, classes) f32, using pre-padded params from
    prepare_classifier_params()."""
    B, dim = x.shape
    assert dim == params["dim"], "feature dim mismatch with prepared params"
    classes = params["classes"]
    w1_p, b1_p, w2_p, b2_p = params["w1"], params["b1"], params["w2"], params["b2"]
    dim_p, hid_p = w1_p.shape
    cls_p = w2_p.shape[1]

    n_tiles, tile_rows, B_p = _choose_row_tiling(B, tm)

    if dim == dim_p and B == B_p:
        # Fast path: no wrapper-side copy of the activation at all; the bf16
        # cast happens inside the kernel.
        x_in = x
    else:
        # Unaligned path: pad rows / feature dim (zero padding is numerically
        # inert for this MLP); cast to bf16 since we are copying anyway.
        x_in = jnp.zeros((B_p, dim_p), jnp.bfloat16).at[:B, :dim].set(x.astype(jnp.bfloat16))

    x_bytes = B_p * dim_p * jnp.dtype(x_in.dtype).itemsize
    cost = pl.CostEstimate(
        flops=2 * B_p * dim_p * hid_p + 2 * B_p * hid_p * cls_p,
        transcendentals=0,
        bytes_accessed=(x_bytes + w1_p.size * 2 + w2_p.size * 2
                        + b1_p.size * 4 + b2_p.size * 4 + B_p * cls_p * 4),
    )

    out = pl.pallas_call(
        mlp_kernel,
        out_shape=jax.ShapeDtypeStruct((B_p, cls_p), jnp.float32),
        grid=(n_tiles,),
        in_specs=[
            pl.BlockSpec((tile_rows, dim_p), lambda i: (i, 0)),   # x row tile (pipelined)
            pl.BlockSpec((dim_p, hid_p), lambda i: (0, 0)),       # W1 resident
            pl.BlockSpec((1, hid_p), lambda i: (0, 0)),           # b1 resident
            pl.BlockSpec((hid_p, cls_p), lambda i: (0, 0)),       # W2 resident
            pl.BlockSpec((1, cls_p), lambda i: (0, 0)),           # b2 resident
        ],
        out_specs=pl.BlockSpec((tile_rows, cls_p), lambda i: (i, 0)),
        compiler_params=pltpu.CompilerParams(
            dimension_semantics=("parallel",),    # row tiles can split across TCs (v7x)
        ),
        cost_estimate=cost,
    )(x_in, w1_p, b1_p, w2_p, b2_p)

    return out[:B, :classes]


def init_params(key, dim, hidden, classes):
    """Deterministic init mimicking nn.Linear's default U(-1/sqrt(fan_in), +1/sqrt(fan_in))."""
    k1, k2, k3, k4 = jax.random.split(key, 4)
    bound1 = 1.0 / jnp.sqrt(dim)
    bound2 = 1.0 / jnp.sqrt(hidden)
    w1 = jax.random.uniform(k1, (dim, hidden), jnp.float32, -bound1, bound1)
    b1 = jax.random.uniform(k2, (1, hidden), jnp.float32, -bound1, bound1)
    w2 = jax.random.uniform(k3, (hidden, classes), jnp.float32, -bound2, bound2)
    b2 = jax.random.uniform(k4, (1, classes), jnp.float32, -bound2, bound2)
    return w1, b1, w2, b2


if __name__ == "__main__":
    key = jax.random.PRNGKey(0)
    k_x, k_p = jax.random.split(key)

    dim, hidden, classes = 512, 1000, 2
    w1, b1, w2, b2 = init_params(k_p, dim, hidden, classes)

    # Weight prep is hoisted: done once, reused for every forward call.
    params = prepare_classifier_params(w1, b1, w2, b2)

    # ---- aligned batch (dim % 128 == 0, B multiple of 16): zero-copy x path ----
    B = 16
    x = jax.random.normal(k_x, (B, dim), jnp.float32)
    out = jax.block_until_ready(classifier_forward(x, params))
    assert out.shape == (B, classes)

    # Reference mirroring the kernel's bf16 transport (f32 accumulation).
    xb = x.astype(jnp.bfloat16).astype(jnp.float32)
    w1b = w1.astype(jnp.bfloat16).astype(jnp.float32)
    w2b = w2.astype(jnp.bfloat16).astype(jnp.float32)
    h = jnp.maximum(xb @ w1b + b1, 0.0)
    ref_bf16 = h.astype(jnp.bfloat16).astype(jnp.float32) @ w2b + b2
    assert jnp.allclose(out, ref_bf16, atol=1e-2, rtol=1e-2)

    # Loose check against the pure-f32 PyTorch-equivalent forward.
    ref_f32 = jnp.maximum(x @ w1 + b1, 0.0) @ w2 + b2
    assert jnp.allclose(out, ref_f32, atol=5e-2, rtol=5e-2)

    # ---- unaligned batch exercises the padded path ----
    B2 = 5
    x2 = jax.random.normal(k_x, (B2, dim), jnp.float32)
    out2 = jax.block_until_ready(classifier_forward(x2, params))
    assert out2.shape == (B2, classes)
    ref2 = jnp.maximum(x2 @ w1 + b1, 0.0) @ w2 + b2
    assert jnp.allclose(out2, ref2, atol=5e-2, rtol=5e-2)

    print("KERNEL_OK")
</pallas_src>

<mosaic_0001>
module attributes {stable_mosaic.version = 11 : i64} {
  func.func @mlp_kernel(%arg0: i32, %arg1: memref<16x512xf32, #tpu.memory_space<vmem>>, %arg2: memref<512x1024xbf16, #tpu.memory_space<vmem>>, %arg3: memref<1x1024xf32, #tpu.memory_space<vmem>>, %arg4: memref<1024x128xbf16, #tpu.memory_space<vmem>>, %arg5: memref<1x128xf32, #tpu.memory_space<vmem>>, %arg6: memref<16x128xf32, #tpu.memory_space<vmem>>) attributes {dimension_semantics = [#tpu.dimension_semantics<parallel>], iteration_bounds = array<i64: 1>, scalar_prefetch = 0 : i64, scratch_operands = 0 : i64, tpu.core_type = #tpu.core_type<tc>, window_params = [{transform_indices = @transform_0, window_bounds = array<i64: 16, 512>}, {pipeline_mode = #tpu.pipeline_mode<synchronous>, transform_indices = @transform_1, window_bounds = array<i64: 512, 1024>}, {pipeline_mode = #tpu.pipeline_mode<synchronous>, transform_indices = @transform_2, window_bounds = array<i64: 1, 1024>}, {pipeline_mode = #tpu.pipeline_mode<synchronous>, transform_indices = @transform_3, window_bounds = array<i64: 1024, 128>}, {pipeline_mode = #tpu.pipeline_mode<synchronous>, transform_indices = @transform_4, window_bounds = array<i64: 1, 128>}, {transform_indices = @transform_5, window_bounds = array<i64: 16, 128>}]} {
    %c0 = arith.constant 0 : index
    %c0_0 = arith.constant 0 : index
    %0 = vector.load %arg1[%c0, %c0_0] : memref<16x512xf32, #tpu.memory_space<vmem>>, vector<16x512xf32>
    %1 = arith.truncf %0 : vector<16x512xf32> to vector<16x512xbf16>
    %c0_1 = arith.constant 0 : index
    %c0_2 = arith.constant 0 : index
    %2 = vector.load %arg2[%c0_1, %c0_2] : memref<512x1024xbf16, #tpu.memory_space<vmem>>, vector<512x1024xbf16>
    %cst = arith.constant dense<0.000000e+00> : vector<16x1024xf32>
    %3 = tpu.matmul %1, %2, %cst {dimension_numbers = #tpu.dot_dimension_numbers<[1], [0], [0], [1], [0, 0, 1, 1], [], []>} : vector<16x512xbf16>, vector<512x1024xbf16>, vector<16x1024xf32> -> vector<16x1024xf32>
    %c0_3 = arith.constant 0 : index
    %c0_4 = arith.constant 0 : index
    %4 = vector.load %arg3[%c0_3, %c0_4] : memref<1x1024xf32, #tpu.memory_space<vmem>>, vector<1x1024xf32>
    %5 = vector.broadcast %4 : vector<1x1024xf32> to vector<16x1024xf32>
    %6 = arith.addf %3, %5 : vector<16x1024xf32>
    %cst_5 = arith.constant 0.000000e+00 : f32
    %7 = vector.broadcast %cst_5 : f32 to vector<16x1024xf32>
    %8 = arith.maximumf %6, %7 : vector<16x1024xf32>
    %9 = arith.truncf %8 : vector<16x1024xf32> to vector<16x1024xbf16>
    %c0_6 = arith.constant 0 : index
    %c0_7 = arith.constant 0 : index
    %10 = vector.load %arg4[%c0_6, %c0_7] : memref<1024x128xbf16, #tpu.memory_space<vmem>>, vector<1024x128xbf16>
    %cst_8 = arith.constant dense<0.000000e+00> : vector<16x128xf32>
    %11 = tpu.matmul %9, %10, %cst_8 {dimension_numbers = #tpu.dot_dimension_numbers<[1], [0], [0], [1], [0, 0, 1, 1], [], []>} : vector<16x1024xbf16>, vector<1024x128xbf16>, vector<16x128xf32> -> vector<16x128xf32>
    %c0_9 = arith.constant 0 : index
    %c0_10 = arith.constant 0 : index
    %12 = vector.load %arg5[%c0_9, %c0_10] : memref<1x128xf32, #tpu.memory_space<vmem>>, vector<1x128xf32>
    %13 = vector.broadcast %12 : vector<1x128xf32> to vector<16x128xf32>
    %14 = arith.addf %11, %13 : vector<16x128xf32>
    %c0_11 = arith.constant 0 : index
    %c0_12 = arith.constant 0 : index
    %15 = vector.load %arg6[%c0_11, %c0_12] : memref<16x128xf32, #tpu.memory_space<vmem>>, vector<16x128xf32>
    tpu.vector_store %arg6[%c0_11, %c0_12], %14 {strides = array<i32>} : memref<16x128xf32, #tpu.memory_space<vmem>>, vector<16x128xf32>,
    return
  }
  func.func @transform_0(%arg0: i32) -> (i32, i32) {
    %c0_i32 = arith.constant 0 : i32
    %c0_i32_0 = arith.constant 0 : i32
    return %arg0, %c0_i32 : i32, i32
  }
  func.func @transform_1(%arg0: i32) -> (i32, i32) {
    %c0_i32 = arith.constant 0 : i32
    %c0_i32_0 = arith.constant 0 : i32
    %c0_i32_1 = arith.constant 0 : i32
    return %c0_i32, %c0_i32_0 : i32, i32
  }
  func.func @transform_2(%arg0: i32) -> (i32, i32) {
    %c0_i32 = arith.constant 0 : i32
    %c0_i32_0 = arith.constant 0 : i32
    %c0_i32_1 = arith.constant 0 : i32
    return %c0_i32, %c0_i32_0 : i32, i32
  }
  func.func @transform_3(%arg0: i32) -> (i32, i32) {
    %c0_i32 = arith.constant 0 : i32
    %c0_i32_0 = arith.constant 0 : i32
    %c0_i32_1 = arith.constant 0 : i32
    return %c0_i32, %c0_i32_0 : i32, i32
  }
  func.func @transform_4(%arg0: i32) -> (i32, i32) {
    %c0_i32 = arith.constant 0 : i32
    %c0_i32_0 = arith.constant 0 : i32
    %c0_i32_1 = arith.constant 0 : i32
    return %c0_i32, %c0_i32_0 : i32, i32
  }
  func.func @transform_5(%arg0: i32) -> (i32, i32) {
    %c0_i32 = arith.constant 0 : i32
    %c0_i32_0 = arith.constant 0 : i32
    return %arg0, %c0_i32 : i32, i32
  }
}

</mosaic_0001>

<bundles_post_ra>
// kernel: tpu_custom_call.1
= control target key start
LH: loop header
LB: loop body
LE: loop exit
PB: predicated region body
PF: predicated region fallthrough
CT: control target
= control target key end

     0   :  { %10 = vsyncpa [#allocation3], 0  ;;  %s4686_s0 = inlined_call_operand.hbm [shape: f32[16,512], index: 0, kind: input, shape index: {}]   ;;  %s4687_s1 = inlined_call_operand.hbm [shape: bf16[512,1024], index: 1, kind: input, shape index: {}]   ;;  %s4688_s2 = inlined_call_operand.hbm [shape: f32[1,1024], index: 2, kind: input, shape index: {}]   ;;  %s4689_s3 = inlined_call_operand.hbm [shape: bf16[1024,128], index: 3, kind: input, shape index: {}]   ;;  %s4690_s4 = inlined_call_operand.vmem [shape: f32[1,128], index: 4, kind: input, shape index: {}]   ;;  %s4691_s5 = inlined_call_operand.hbm [shape: f32[16,128], index: 5, kind: output, shape index: {}]  }
   0x1   :  { %11 = vsyncpa [#allocation6], 0 }
   0x2   :  { %12 = vsyncpa [#allocation9], 0 }
   0x3   :  { %13 = vsyncpa [#allocation4], 0  ;;  %s31_s20 = sshll.u32 %s4687_s1, 4  ;;  %s4511_s21 = smov [#allocation5]   ;;  %s32_s20 = int_to_ptr.hbm [resolvable:$true] %s31_s20 }
   0x4   :  { %s33_s22 = sshll.u32 %s4511_s21, 4  ;;  %s18_s25 = sshll.u32 %s4686_s0, 4  ;;  %s34_s22 = int_to_ptr.vmem [resolvable:$true] %s33_s22  ;;  %s19_s25 = int_to_ptr.hbm [resolvable:$true] %s18_s25 }
   0x5   :  { %s4512_s26 = smov 512   ;;  %s4513_s27 = smov 32  }
   0x6   :  { %39 = dma.hbm_to_vmem [thread:$0]  %s32_s20, 32768, %s34_s22, [#allocation6], %s4512_s26, %s4512_s26, %s4513_s27  }
   0x7   :  { %s4514_s28 = smov [#allocation2]   ;;  %s45_s7 = sshll.u32 %s4688_s2, 4  ;;  %s46_s7 = int_to_ptr.hbm [resolvable:$true] %s45_s7 }
   0x8   :  { %s20_s29 = sshll.u32 %s4514_s28, 4  ;;  %s55_s9 = sshll.u32 %s4689_s3, 4  ;;  %s21_s29 = int_to_ptr.vmem [resolvable:$true] %s20_s29  ;;  %s56_s9 = int_to_ptr.hbm [resolvable:$true] %s55_s9 }
   0x9   :  { %26 = dma.hbm_to_vmem [thread:$0]  %s19_s25, 1024, %s21_s29, [#allocation3], %s4512_s26, %s4512_s26, %s4513_s27  }
   0xa   :  { %s4515_s10 = smov [#allocation7]   ;;  %s4516_s0 = smov [#allocation8]  }
   0xb   :  { %s47_s11 = sshll.u32 %s4515_s10, 4  ;;  %s57_s12 = sshll.u32 %s4516_s0, 4  ;;  %s48_s11 = int_to_ptr.vmem [resolvable:$true] %s47_s11  ;;  %s58_s12 = int_to_ptr.vmem [resolvable:$true] %s57_s12 }
   0xc   :  { %50 = dma.hbm_to_vmem [thread:$0]  %s46_s7, 128, %s48_s11, [#allocation6]  }
   0xd   :  { %s4517_s13 = smov 64   ;;  %s4518_s14 = smov 4  }
   0xe   :  { %63 = dma.hbm_to_vmem [thread:$0]  %s56_s9, 8192, %s58_s12, [#allocation9], %s4517_s13, %s4517_s13, %s4518_s14  }
   0xf   :  { %4503 = dma.done.wait [#allocation3], 1024  }
  0x10   :  { %4504 = vsyncadd [#allocation3], 4294966272 }
  0x11   :  { %4505 = dma.done.wait [#allocation6], 32896  }
  0x12   :  { %4506 = vsyncadd [#allocation6], 4294934400 }
  0x13   :  { %4507 = dma.done.wait [#allocation9], 8192  }
  0x14   :  { %4508 = vsyncadd [#allocation9], 4294959104  ;;  %v2997_v0 = vld [vmem:[#allocation5 + $0x1c0] sm:$0xf]  ;;  %s2756_s18 = sshll.u32 %s4691_s5, 4  ;;  %s4520_s19 = smov 128   ;;  %s2757_s18 = int_to_ptr.hbm [resolvable:$true] %s2756_s18 }
  0x15   :  { %v4111_v1 = vld [vmem:[#allocation5 + $0x1dc] sm:$0xf0]  ;;  %s4521_s20 = smov 8  }
  0x16   :  { %v3253_v2 = vld [vmem:[#allocation5 + $0x3c0] sm:$0xf]  ;;  %v2998_v3 = vor.u32 %v4111_v1, %v2997_v0 }
  0x17   :  { %v4175_v4 = vld [vmem:[#allocation5 + $0x3dc] sm:$0xf0] }
  0x18   :  { %v3509_v5 = vld [vmem:[#allocation5 + $0x5c0] sm:$0xf]  ;;  %v3254_v7 = vor.u32 %v4175_v4, %v3253_v2  ;;  %1648 = vmatpush.bf16.msra.mxu0 %v2998_v3 }
  0x19   :  { %v4239_v6 = vld [vmem:[#allocation5 + $0x5dc] sm:$0xf0] }
  0x1a   :  { %v3510_v8 = vor.u32 %v4239_v6, %v3509_v5  ;;  %v3765_v9 = vld [vmem:[#allocation5 + $0x7c0] sm:$0xf]  ;;  %1662 = vmatpush.bf16.msra.mxu1 %v3254_v7 }
  0x1b   :  { %v4303_v10 = vld [vmem:[#allocation5 + $0x7dc] sm:$0xf0] }
  0x1c   :  { %v2965_v11 = vld [vmem:[#allocation5 + $0x180] sm:$0xf]  ;;  %v3766_v12 = vor.u32 %v4303_v10, %v3765_v9  ;;  %1676 = vmatpush.bf16.msra.mxu2 %v3510_v8 }
  0x1d   :  { %v4103_v13 = vld [vmem:[#allocation5 + $0x19c] sm:$0xf0] }
  0x1e   :  { %v3221_v14 = vld [vmem:[#allocation5 + $0x380] sm:$0xf]  ;;  %v2966_v16 = vor.u32 %v4103_v13, %v2965_v11  ;;  %1690 = vmatpush.bf16.msra.mxu3 %v3766_v12 }
  0x1f   :  { %v4167_v15 = vld [vmem:[#allocation5 + $0x39c] sm:$0xf0] }
  0x20   :  { %v3222_v17 = vor.u32 %v4167_v15, %v3221_v14  ;;  %v3477_v18 = vld [vmem:[#allocation5 + $0x580] sm:$0xf]  ;;  %1649 = vmatpush.bf16.msra.mxu0 %v2966_v16 }
  0x21   :  { %v4231_v19 = vld [vmem:[#allocation5 + $0x59c] sm:$0xf0] }
  0x22   :  { %v3733_v20 = vld [vmem:[#allocation5 + $0x780] sm:$0xf]  ;;  %v3478_v21 = vor.u32 %v4231_v19, %v3477_v18  ;;  %1663 = vmatpush.bf16.msra.mxu1 %v3222_v17 }
  0x23   :  { %v4295_v22 = vld [vmem:[#allocation5 + $0x79c] sm:$0xf0] }
  0x24   :  { %v2933_v23 = vld [vmem:[#allocation5 + $0x140] sm:$0xf]  ;;  %v3734_v25 = vor.u32 %v4295_v22, %v3733_v20  ;;  %1677 = vmatpush.bf16.msra.mxu2 %v3478_v21 }
  0x25   :  { %v4095_v24 = vld [vmem:[#allocation5 + $0x15c] sm:$0xf0] }
  0x26   :  { %v3189_v26 = vld [vmem:[#allocation5 + $0x340] sm:$0xf]  ;;  %v2934_v29 = vor.u32 %v4095_v24, %v2933_v23  ;;  %1691 = vmatpush.bf16.msra.mxu3 %v3734_v25 }
  0x27   :  { %v4159_v27 = vld [vmem:[#allocation5 + $0x35c] sm:$0xf0] }
  0x28   :  { %v3445_v28 = vld [vmem:[#allocation5 + $0x540] sm:$0xf]  ;;  %v3190_v33 = vor.u32 %v4159_v27, %v3189_v26  ;;  %1650 = vmatpush.bf16.msra.mxu0 %v2934_v29  ;;  %v2999_v29 = vld [vmem:[#allocation5 + $0x1e0] sm:$0xf0] }
  0x29   :  { %v4223_v30 = vld [vmem:[#allocation5 + $0x55c] sm:$0xf0] }
  0x2a   :  { %v3701_v31 = vld [vmem:[#allocation5 + $0x740] sm:$0xf]  ;;  %v3446_v34 = vor.u32 %v4223_v30, %v3445_v28  ;;  %1664 = vmatpush.bf16.msra.mxu1 %v3190_v33  ;;  %v4107_v28 = vld [vmem:[#allocation5 + $0x1c4] sm:$0xf] }
  0x2b   :  { %v4287_v32 = vld [vmem:[#allocation5 + $0x75c] sm:$0xf0]  ;;  %v4171_v30 = vld [vmem:[#allocation5 + $0x3c4] sm:$0xf] }
  0x2c   :  { %v2901_v35 = vld [vmem:[#allocation5 + $0x100] sm:$0xf]  ;;  %v3702_v38 = vor.u32 %v4287_v32, %v3701_v31  ;;  %1678 = vmatpush.bf16.msra.mxu2 %v3446_v34  ;;  %v3255_v32 = vld [vmem:[#allocation5 + $0x3e0] sm:$0xf0] }
  0x2d   :  { %v4087_v36 = vld [vmem:[#allocation5 + $0x11c] sm:$0xf0]  ;;  %v4235_v33 = vld [vmem:[#allocation5 + $0x5c4] sm:$0xf] }
  0x2e   :  { %v3157_v37 = vld [vmem:[#allocation5 + $0x300] sm:$0xf]  ;;  %v2902_v44 = vor.u32 %v4087_v36, %v2901_v35  ;;  %1692 = vmatpush.bf16.msra.mxu3 %v3702_v38  ;;  %v3511_v34 = vld [vmem:[#allocation5 + $0x5e0] sm:$0xf0] }
  0x2f   :  { %v4151_v39 = vld [vmem:[#allocation5 + $0x31c] sm:$0xf0]  ;;  %v3767_v38 = vld [vmem:[#allocation5 + $0x7e0] sm:$0xf0] }
  0x30   :  { %v3413_v40 = vld [vmem:[#allocation5 + $0x500] sm:$0xf]  ;;  %v3158_v45 = vor.u32 %v4151_v39, %v3157_v37  ;;  %1651 = vmatpush.bf16.msra.mxu0 %v2902_v44  ;;  %v4299_v37 = vld [vmem:[#allocation5 + $0x7c4] sm:$0xf] }
  0x31   :  { %v4215_v41 = vld [vmem:[#allocation5 + $0x51c] sm:$0xf0]  ;;  %v2967_v44 = vld [vmem:[#allocation5 + $0x1a0] sm:$0xf0] }
  0x32   :  { %v3669_v42 = vld [vmem:[#allocation5 + $0x700] sm:$0xf]  ;;  %v3414_v46 = vor.u32 %v4215_v41, %v3413_v40  ;;  %1665 = vmatpush.bf16.msra.mxu1 %v3158_v45  ;;  %v3002_v40 = vor.u32 %v4107_v28, %v2999_v29  ;;  %v3258_v41 = vor.u32 %v4171_v30, %v3255_v32  ;;  %v4163_v45 = vld [vmem:[#allocation5 + $0x384] sm:$0xf]  ;;  %v87_v28 = vld [vmem:[#allocation2 + $0x28] sm:$0xff] }
  0x33   :  { %v4279_v43 = vld [vmem:[#allocation5 + $0x71c] sm:$0xf0]  ;;  %v3127_v30 = vld [vmem:[#allocation5 + $0x2e0] sm:$0xf0] }
  0x34   :  { %v2869_v47 = vld [vmem:[#allocation5 + $0xc0] sm:$0xf]  ;;  %v3670_v50 = vor.u32 %v4279_v43, %v3669_v42  ;;  %1679 = vmatpush.bf16.msra.mxu2 %v3414_v46  ;;  %v3514_v42 = vor.u32 %v4235_v33, %v3511_v34  ;;  %v4099_v43 = vld [vmem:[#allocation5 + $0x184] sm:$0xf]  ;;  %v3770_v46 = vor.u32 %v4299_v37, %v3767_v38 }
  0x35   :  { %v4079_v48 = vld [vmem:[#allocation5 + $0xdc] sm:$0xf0]  ;;  %v3383_v32 = vld [vmem:[#allocation5 + $0x4e0] sm:$0xf0] }
  0x36   :  { %v3125_v49 = vld [vmem:[#allocation5 + $0x2c0] sm:$0xf]  ;;  %v2870_v56 = vor.u32 %v4079_v48, %v2869_v47  ;;  %1693 = vmatpush.bf16.msra.mxu3 %v3670_v50  ;;  %v3223_v47 = vld [vmem:[#allocation5 + $0x3a0] sm:$0xf0] }
  0x37   :  { %v4143_v51 = vld [vmem:[#allocation5 + $0x2dc] sm:$0xf0]  ;;  %v4227_v48 = vld [vmem:[#allocation5 + $0x584] sm:$0xf] }
  0x38   :  { %v3381_v52 = vld [vmem:[#allocation5 + $0x4c0] sm:$0xf]  ;;  %v3126_v57 = vor.u32 %v4143_v51, %v3125_v49  ;;  %1652 = vmatpush.bf16.msra.mxu0 %v2870_v56  ;;  %v3479_v49 = vld [vmem:[#allocation5 + $0x5a0] sm:$0xf0] }
  0x39   :  { %v4207_v53 = vld [vmem:[#allocation5 + $0x4dc] sm:$0xf0]  ;;  %v4291_v50 = vld [vmem:[#allocation5 + $0x784] sm:$0xf] }
  0x3a   :  { %v3637_v54 = vld [vmem:[#allocation5 + $0x6c0] sm:$0xf]  ;;  %v3382_v58 = vor.u32 %v4207_v53, %v3381_v52  ;;  %1666 = vmatpush.bf16.msra.mxu1 %v3126_v57  ;;  %v3735_v51 = vld [vmem:[#allocation5 + $0x7a0] sm:$0xf0]  ;;  %v2970_v52 = vor.u32 %v4099_v43, %v2967_v44 }
  0x3b   :  { %v4271_v55 = vld [vmem:[#allocation5 + $0x6dc] sm:$0xf0]  ;;  %v4091_v53 = vld [vmem:[#allocation5 + $0x144] sm:$0xf] }
  0x3c   :  { %v2837_v59 = vld [vmem:[#allocation5 + $0x80] sm:$0xf]  ;;  %v3638_v62 = vor.u32 %v4271_v55, %v3637_v54  ;;  %1680 = vmatpush.bf16.msra.mxu2 %v3382_v58  ;;  %v3226_v54 = vor.u32 %v4163_v45, %v3223_v47  ;;  %v3482_v55 = vor.u32 %v4227_v48, %v3479_v49  ;;  %v2935_v56 = vld [vmem:[#allocation5 + $0x160] sm:$0xf0] }
  0x3d   :  { %v4071_v60 = vld [vmem:[#allocation5 + $0x9c] sm:$0xf0]  ;;  %v4155_v57 = vld [vmem:[#allocation5 + $0x344] sm:$0xf] }
  0x3e   :  { %v3093_v61 = vld [vmem:[#allocation5 + $0x280] sm:$0xf]  ;;  %v2838_v4 = vor.u32 %v4071_v60, %v2837_v59  ;;  %1694 = vmatpush.bf16.msra.mxu3 %v3638_v62  ;;  %v3191_v58 = vld [vmem:[#allocation5 + $0x360] sm:$0xf0]  ;;  %v3738_v59 = vor.u32 %v4291_v50, %v3735_v51 }
  0x3f   :  { %v4135_v63 = vld [vmem:[#allocation5 + $0x29c] sm:$0xf0]  ;;  %v4219_v60 = vld [vmem:[#allocation5 + $0x544] sm:$0xf] }
  0x40   :  { %v3349_v0 = vld [vmem:[#allocation5 + $0x480] sm:$0xf]  ;;  %v3094_v5 = vor.u32 %v4135_v63, %v3093_v61  ;;  %1653 = vmatpush.bf16.msra.mxu0 %v2838_v4  ;;  %v3447_v61 = vld [vmem:[#allocation5 + $0x560] sm:$0xf0] }
  0x41   :  { %v4199_v1 = vld [vmem:[#allocation5 + $0x49c] sm:$0xf0]  ;;  %v4283_v62 = vld [vmem:[#allocation5 + $0x744] sm:$0xf] }
  0x42   :  { %v3605_v2 = vld [vmem:[#allocation5 + $0x680] sm:$0xf]  ;;  %v3350_v6 = vor.u32 %v4199_v1, %v3349_v0  ;;  %1667 = vmatpush.bf16.msra.mxu1 %v3094_v5  ;;  %v3703_v63 = vld [vmem:[#allocation5 + $0x760] sm:$0xf0]  ;;  %v84_v5 = vld [vmem:[#allocation2 + $0x10] sm:$0xff] }
  0x43   :  { %v4263_v3 = vld [vmem:[#allocation5 + $0x69c] sm:$0xf0]  ;;  %v4083_v0 = vld [vmem:[#allocation5 + $0x104] sm:$0xf] }
  0x44   :  { %v2805_v7 = vld [vmem:[#allocation5 + $0x40] sm:$0xf]  ;;  %v3606_v10 = vor.u32 %v4263_v3, %v3605_v2  ;;  %1681 = vmatpush.bf16.msra.mxu2 %v3350_v6  ;;  %v2903_v1 = vld [vmem:[#allocation5 + $0x120] sm:$0xf0]  ;;  %v2938_v2 = vor.u32 %v4091_v53, %v2935_v56  ;;  %v88_v6 = vld [vmem:[#allocation2 + $0x30] sm:$0xff] }
  0x45   :  { %v4063_v8 = vld [vmem:[#allocation5 + $0x5c] sm:$0xf0]  ;;  %v4147_v3 = vld [vmem:[#allocation5 + $0x304] sm:$0xf] }
  0x46   :  { %v3061_v9 = vld [vmem:[#allocation5 + $0x240] sm:$0xf]  ;;  %v2806_v16 = vor.u32 %v4063_v8, %v2805_v7  ;;  %1695 = vmatpush.bf16.msra.mxu3 %v3606_v10  ;;  %v3159_v4 = vld [vmem:[#allocation5 + $0x320] sm:$0xf0]  ;;  %v3194_v7 = vor.u32 %v4155_v57, %v3191_v58  ;;  %v3450_v8 = vor.u32 %v4219_v60, %v3447_v61 }
  0x47   :  { %v4127_v11 = vld [vmem:[#allocation5 + $0x25c] sm:$0xf0]  ;;  %v4267_v34 = vld [vmem:[#allocation5 + $0x6c4] sm:$0xf] }
  0x48   :  { %v3317_v12 = vld [vmem:[#allocation5 + $0x440] sm:$0xf]  ;;  %v3062_v19 = vor.u32 %v4127_v11, %v3061_v9  ;;  %1654 = vmatpush.bf16.msra.mxu0 %v2806_v16  ;;  %v4564_v9 = vpack.c.bf16 %v88_v6, %v84_v5  ;;  %v3095_v43 = vld [vmem:[#allocation5 + $0x2a0] sm:$0xf0] }
  0x49   :  { %v4191_v13 = vld [vmem:[#allocation5 + $0x45c] sm:$0xf0]  ;;  %v4195_v44 = vld [vmem:[#allocation5 + $0x484] sm:$0xf] }
  0x4a   :  { %v3573_v14 = vld [vmem:[#allocation5 + $0x640] sm:$0xf]  ;;  %v3318_v20 = vor.u32 %v4191_v13, %v3317_v12  ;;  %1668 = vmatpush.bf16.msra.mxu1 %v3062_v19  ;;  %v85_v12 = vld [vmem:[#allocation2 + $0x18] sm:$0xff]  ;;  %v3706_v13 = vor.u32 %v4283_v62, %v3703_v63  ;;  %v3671_v19 = vld [vmem:[#allocation5 + $0x720] sm:$0xf0] }
  0x4b   :  { %v4255_v15 = vld [vmem:[#allocation5 + $0x65c] sm:$0xf0]  ;;  %v3351_v45 = vld [vmem:[#allocation5 + $0x4a0] sm:$0xf0] }
  0x4c   :  { %v2773_v17 = vld [vmem:[#allocation5] sm:$0xf]  ;;  %v3574_v24 = vor.u32 %v4255_v15, %v3573_v14  ;;  %1682 = vmatpush.bf16.msra.mxu2 %v3318_v20  ;;  %v4211_v14 = vld [vmem:[#allocation5 + $0x504] sm:$0xf]  ;;  %v3354_v50 = vor.u32 %v4195_v44, %v3351_v45  ;;  %v3453_v44 = vld [vmem:[#allocation5 + $0x548] sm:$0xf] }
  0x4d   :  { %v4055_v18 = vld [vmem:[#allocation5 + $0x1c] sm:$0xf0]  ;;  %v3415_v15 = vld [vmem:[#allocation5 + $0x520] sm:$0xf0]  ;;  %v4224_v45 = vld [vmem:[#allocation5 + $0x564] sm:$0xf0] }
  0x4e   :  { %v3029_v21 = vld [vmem:[#allocation5 + $0x200] sm:$0xf]  ;;  %v2774_v31 = vor.u32 %v4055_v18, %v2773_v17  ;;  %1696 = vmatpush.bf16.msra.mxu3 %v3574_v24  ;;  %v89_v17 = vld [vmem:[#allocation2 + $0x38] sm:$0xff]  ;;  %v4275_v18 = vld [vmem:[#allocation5 + $0x704] sm:$0xf]  ;;  %v3162_v24 = vor.u32 %v4147_v3, %v3159_v4 }
  0x4f   :  { %v4119_v22 = vld [vmem:[#allocation5 + $0x21c] sm:$0xf0]  ;;  %v4569_v20 = vpack.c.bf16 %v89_v17, %v85_v12  ;;  %v3674_v29 = vor.u32 %v4275_v18, %v3671_v19  ;;  %v3607_v47 = vld [vmem:[#allocation5 + $0x6a0] sm:$0xf0]  ;;  %v3773_v19 = vld [vmem:[#allocation5 + $0x7c8] sm:$0xf] }
  0x50   :  { %v3285_v23 = vld [vmem:[#allocation5 + $0x400] sm:$0xf]  ;;  %v3030_v35 = vor.u32 %v4119_v22, %v3029_v21  ;;  %1655 = vmatpush.bf16.msra.mxu0 %v2774_v31  ;;  %v2906_v21 = vor.u32 %v4083_v0, %v2903_v1  ;;  %v4075_v22 = vld [vmem:[#allocation5 + $0xc4] sm:$0xf] }
  0x51   :  { %v4183_v25 = vld [vmem:[#allocation5 + $0x41c] sm:$0xf0]  ;;  %v4203_v31 = vld [vmem:[#allocation5 + $0x4c4] sm:$0xf] }
  0x52   :  { %v3541_v26 = vld [vmem:[#allocation5 + $0x600] sm:$0xf]  ;;  %v3286_v36 = vor.u32 %v4183_v25, %v3285_v23  ;;  %1669 = vmatpush.bf16.msra.mxu1 %v3030_v35  ;;  %v2871_v23 = vld [vmem:[#allocation5 + $0xe0] sm:$0xf0]  ;;  %v3418_v25 = vor.u32 %v4211_v14, %v3415_v15  ;;  %v3386_v38 = vor.u32 %v4203_v31, %v3383_v32  ;;  %v3517_v14 = vld [vmem:[#allocation5 + $0x5c8] sm:$0xf] }
  0x53   :  { %v4247_v27 = vld [vmem:[#allocation5 + $0x61c] sm:$0xf0]  ;;  %v3639_v35 = vld [vmem:[#allocation5 + $0x6e0] sm:$0xf0]  ;;  %v4240_v15 = vld [vmem:[#allocation5 + $0x5e4] sm:$0xf0] }
  0x54   :  { %v3542_v39 = vor.u32 %v4247_v27, %v3541_v26  ;;  %1683 = vmatpush.bf16.msra.mxu2 %v3286_v36  ;;  %1704 = vmatpush.bf16.msrb.mxu0 %v3002_v40  ;;  %v82_v10 = vld [vmem:[#allocation2] sm:$0xff]  ;;  %v83_v27 = vld [vmem:[#allocation2 + $0x8] sm:$0xff]  ;;  %v2874_v36 = vor.u32 %v4075_v22, %v2871_v23 }
  0x55   :  { %v86_v11 = vld [vmem:[#allocation2 + $0x20] sm:$0xff]  ;;  %v4572_v33 = vpack.c.bf16 %v87_v28, %v83_v27  ;;  %v4104_v27 = vld [vmem:[#allocation5 + $0x1a4] sm:$0xf0] }
  0x56   :  { %1697 = vmatpush.bf16.msra.mxu3 %v3542_v39  ;;  %1718 = vmatpush.bf16.msrb.mxu1 %v3258_v41  ;;  %v4566_v16 = vpack.c.bf16 %v86_v11, %v82_v10  ;;  %v4139_v26 = vld [vmem:[#allocation5 + $0x2c4] sm:$0xf]  ;;  %v4112_v10 = vld [vmem:[#allocation5 + $0x1e4] sm:$0xf0] }
  0x57   :  { %1684 = vmatmul.bf16.vlgmr.msra.gmra.mxu2 %v4564_v9  ;;  %1670 = vmatmul.bf16.vlgmr.msra.gmra.mxu1 %v4572_v33  ;;  %v3130_v37 = vor.u32 %v4139_v26, %v3127_v30  ;;  %v4067_v39 = vld [vmem:[#allocation5 + $0x84] sm:$0xf]  ;;  %v3261_v11 = vld [vmem:[#allocation5 + $0x3c8] sm:$0xf] }
  0x58   :  { %1732 = vmatpush.bf16.msrb.mxu2 %v3514_v42  ;;  %1705 = vmatpush.bf16.msrb.mxu0 %v2970_v52  ;;  %v2839_v40 = vld [vmem:[#allocation5 + $0xa0] sm:$0xf0]  ;;  %v3642_v42 = vor.u32 %v4267_v34, %v3639_v35  ;;  %v2973_v26 = vld [vmem:[#allocation5 + $0x188] sm:$0xf] }
  0x59   :  { %1656 = vmatmul.bf16.vlgmr.msra.gmra.mxu0 %v4566_v16  ;;  %1698 = vmatmul.bf16.vlgmr.msra.gmra.mxu3 %v4569_v20  ;;  %v4131_v41 = vld [vmem:[#allocation5 + $0x284] sm:$0xf]  ;;  %v2842_v48 = vor.u32 %v4067_v39, %v2839_v40  ;;  %v3229_v28 = vld [vmem:[#allocation5 + $0x388] sm:$0xf] }
  0x5a   :  { %1746 = vmatpush.bf16.msrb.mxu3 %v3770_v46  ;;  %1719 = vmatpush.bf16.msrb.mxu1 %v3226_v54  ;;  %v4259_v46 = vld [vmem:[#allocation5 + $0x684] sm:$0xf]  ;;  %v3098_v49 = vor.u32 %v4131_v41, %v3095_v43  ;;  %v4168_v30 = vld [vmem:[#allocation5 + $0x3a4] sm:$0xf0] }
  0x5b   :  { %v4059_v51 = vld [vmem:[#allocation5 + $0x44] sm:$0xf]  ;;  %v3610_v54 = vor.u32 %v4259_v46, %v3607_v47  ;;  %v3485_v31 = vld [vmem:[#allocation5 + $0x588] sm:$0xf] }
  0x5c   :  { %1733 = vmatpush.bf16.msrb.mxu2 %v3482_v55  ;;  %1706 = vmatpush.bf16.msrb.mxu0 %v2938_v2  ;;  %v2807_v52 = vld [vmem:[#allocation5 + $0x60] sm:$0xf0]  ;;  %v4232_v32 = vld [vmem:[#allocation5 + $0x5a4] sm:$0xf0] }
  0x5d   :  { %v4123_v53 = vld [vmem:[#allocation5 + $0x244] sm:$0xf]  ;;  %v2810_v60 = vor.u32 %v4059_v51, %v2807_v52  ;;  %v3741_v34 = vld [vmem:[#allocation5 + $0x788] sm:$0xf] }
  0x5e   :  { %1747 = vmatpush.bf16.msrb.mxu3 %v3738_v59  ;;  %1720 = vmatpush.bf16.msrb.mxu1 %v3194_v7  ;;  %v3063_v55 = vld [vmem:[#allocation5 + $0x260] sm:$0xf0]  ;;  %v4296_v35 = vld [vmem:[#allocation5 + $0x7a4] sm:$0xf0] }
  0x5f   :  { %v4187_v56 = vld [vmem:[#allocation5 + $0x444] sm:$0xf]  ;;  %v3066_v63 = vor.u32 %v4123_v53, %v3063_v55  ;;  %v2941_v39 = vld [vmem:[#allocation5 + $0x148] sm:$0xf] }
  0x60   :  { %1734 = vmatpush.bf16.msrb.mxu2 %v3450_v8  ;;  %1707 = vmatpush.bf16.msrb.mxu0 %v2906_v21  ;;  %v3319_v57 = vld [vmem:[#allocation5 + $0x460] sm:$0xf0]  ;;  %v3005_v8 = vld [vmem:[#allocation5 + $0x1c8] sm:$0xf] }
  0x61   :  { %v4251_v58 = vld [vmem:[#allocation5 + $0x644] sm:$0xf]  ;;  %v3322_v0 = vor.u32 %v4187_v56, %v3319_v57  ;;  %v4304_v21 = vld [vmem:[#allocation5 + $0x7e4] sm:$0xf0]  ;;  %v3006_v23 = vor.u32 %v4112_v10, %v3005_v8 }
  0x62   :  { %1748 = vmatpush.bf16.msrb.mxu3 %v3706_v13  ;;  %1721 = vmatpush.bf16.msrb.mxu1 %v3162_v24  ;;  %v3575_v59 = vld [vmem:[#allocation5 + $0x660] sm:$0xf0]  ;;  %v4176_v13 = vld [vmem:[#allocation5 + $0x3e4] sm:$0xf0] }
  0x63   :  { %v4051_v61 = vld [vmem:[#allocation5 + $0x4] sm:$0xf]  ;;  %v3578_v4 = vor.u32 %v4251_v58, %v3575_v59  ;;  %v3262_v24 = vor.u32 %v4176_v13, %v3261_v11  ;;  %v4096_v40 = vld [vmem:[#allocation5 + $0x164] sm:$0xf0] }
  0x64   :  { %1735 = vmatpush.bf16.msrb.mxu2 %v3418_v25  ;;  %1708 = vmatpush.bf16.msrb.mxu0 %v2874_v36  ;;  %v2775_v62 = vld [vmem:[#allocation5 + $0x20] sm:$0xf0]  ;;  %v3518_v25 = vor.u32 %v4240_v15, %v3517_v14  ;;  %v2974_v36 = vor.u32 %v4104_v27, %v2973_v26  ;;  %v3197_v41 = vld [vmem:[#allocation5 + $0x348] sm:$0xf] }
  0x65   :  { %v4115_v1 = vld [vmem:[#allocation5 + $0x204] sm:$0xf]  ;;  %v2778_v12 = vor.u32 %v4051_v61, %v2775_v62  ;;  %v4160_v43 = vld [vmem:[#allocation5 + $0x364] sm:$0xf0] }
  0x66   :  { %1749 = vmatpush.bf16.msrb.mxu3 %v3674_v29  ;;  %1722 = vmatpush.bf16.msrb.mxu1 %v3130_v37  ;;  %v3031_v2 = vld [vmem:[#allocation5 + $0x220] sm:$0xf0]  ;;  %v3774_v29 = vor.u32 %v4304_v21, %v3773_v19  ;;  %v3230_v37 = vor.u32 %v4168_v30, %v3229_v28  ;;  %v3709_v46 = vld [vmem:[#allocation5 + $0x748] sm:$0xf] }
  0x67   :  { %v4179_v3 = vld [vmem:[#allocation5 + $0x404] sm:$0xf]  ;;  %v3034_v17 = vor.u32 %v4115_v1, %v3031_v2  ;;  %v4288_v47 = vld [vmem:[#allocation5 + $0x764] sm:$0xf0] }
  0x68   :  { %1736 = vmatpush.bf16.msrb.mxu2 %v3386_v38  ;;  %1709 = vmatpush.bf16.msrb.mxu0 %v2842_v48  ;;  %v3287_v5 = vld [vmem:[#allocation5 + $0x420] sm:$0xf0]  ;;  %v3486_v38 = vor.u32 %v4232_v32, %v3485_v31  ;;  %v2942_v48 = vor.u32 %v4096_v40, %v2941_v39  ;;  %v2909_v51 = vld [vmem:[#allocation5 + $0x108] sm:$0xf] }
  0x69   :  { %v4243_v6 = vld [vmem:[#allocation5 + $0x604] sm:$0xf]  ;;  %v3290_v18 = vor.u32 %v4179_v3, %v3287_v5  ;;  %v4088_v52 = vld [vmem:[#allocation5 + $0x124] sm:$0xf0] }
  0x6a   :  { %1750 = vmatpush.bf16.msrb.mxu3 %v3642_v42  ;;  %1723 = vmatpush.bf16.msrb.mxu1 %v3098_v49  ;;  %v3543_v7 = vld [vmem:[#allocation5 + $0x620] sm:$0xf0]  ;;  %v3742_v42 = vor.u32 %v4296_v35, %v3741_v34  ;;  %v3198_v49 = vor.u32 %v4160_v43, %v3197_v41  ;;  %v3165_v53 = vld [vmem:[#allocation5 + $0x308] sm:$0xf] }
  0x6b   :  { %v3546_v22 = vor.u32 %v4243_v6, %v3543_v7  ;;  %v4152_v55 = vld [vmem:[#allocation5 + $0x324] sm:$0xf0] }
  0x6c   :  { %1737 = vmatpush.bf16.msrb.mxu2 %v3354_v50  ;;  %1710 = vmatpush.bf16.msrb.mxu0 %v2810_v60  ;;  %v3454_v50 = vor.u32 %v4224_v45, %v3453_v44  ;;  %v3421_v56 = vld [vmem:[#allocation5 + $0x508] sm:$0xf]  ;;  %v2910_v60 = vor.u32 %v4088_v52, %v2909_v51  ;;  %v3166_v61 = vor.u32 %v4152_v55, %v3165_v53  ;;  %v3263_v52 = vld [vmem:[#allocation5 + $0x3e8] sm:$0xf0] }
  0x6d   :  { %v4216_v57 = vld [vmem:[#allocation5 + $0x524] sm:$0xf0]  ;;  %v4236_v53 = vld [vmem:[#allocation5 + $0x5cc] sm:$0xf] }
  0x6e   :  { %1751 = vmatpush.bf16.msrb.mxu3 %v3610_v54  ;;  %1724 = vmatpush.bf16.msrb.mxu1 %v3066_v63  ;;  %v3710_v54 = vor.u32 %v4288_v47, %v3709_v46  ;;  %v3677_v58 = vld [vmem:[#allocation5 + $0x708] sm:$0xf]  ;;  %v3422_v62 = vor.u32 %v4216_v57, %v3421_v56  ;;  %v4300_v57 = vld [vmem:[#allocation5 + $0x7cc] sm:$0xf] }
  0x6f   :  { %v4280_v59 = vld [vmem:[#allocation5 + $0x724] sm:$0xf0] }
  0x70   :  { %1738 = vmatpush.bf16.msrb.mxu2 %v3322_v0  ;;  %1711 = vmatpush.bf16.msrb.mxu0 %v2778_v12  ;;  %v2877_v63 = vld [vmem:[#allocation5 + $0xc8] sm:$0xf]  ;;  %v3678_v2 = vor.u32 %v4280_v59, %v3677_v58  ;;  %v3775_v58 = vld [vmem:[#allocation5 + $0x7e8] sm:$0xf0] }
  0x71   :  { %v4080_v0 = vld [vmem:[#allocation5 + $0xe4] sm:$0xf0] }
  0x72   :  { %1752 = vmatpush.bf16.msrb.mxu3 %v3578_v4  ;;  %1725 = vmatpush.bf16.msrb.mxu1 %v3034_v17  ;;  %v3133_v1 = vld [vmem:[#allocation5 + $0x2c8] sm:$0xf]  ;;  %v2878_v8 = vor.u32 %v4080_v0, %v2877_v63  ;;  %v4100_v63 = vld [vmem:[#allocation5 + $0x18c] sm:$0xf] }
  0x73   :  { %1712 = vmatmul.bf16.vlgmr.msrb.gmra.mxu0 %v4566_v16  ;;  %v4144_v3 = vld [vmem:[#allocation5 + $0x2e4] sm:$0xf0]  ;;  %v2975_v0 = vld [vmem:[#allocation5 + $0x1a8] sm:$0xf0] }
  0x74   :  { %1739 = vmatpush.bf16.msrb.mxu2 %v3290_v18  ;;  %1760 = vmatpush.bf16.msra.mxu0 %v3006_v23  ;;  %v3389_v4 = vld [vmem:[#allocation5 + $0x4c8] sm:$0xf]  ;;  %v3134_v10 = vor.u32 %v4144_v3, %v3133_v1  ;;  %v4164_v1 = vld [vmem:[#allocation5 + $0x38c] sm:$0xf] }
  0x75   :  { %1726 = vmatmul.bf16.vlgmr.msrb.gmra.mxu1 %v4572_v33  ;;  %v4208_v5 = vld [vmem:[#allocation5 + $0x4e4] sm:$0xf0]  ;;  %v3231_v3 = vld [vmem:[#allocation5 + $0x3a8] sm:$0xf0] }
  0x76   :  { %1753 = vmatpush.bf16.msrb.mxu3 %v3546_v22  ;;  %1774 = vmatpush.bf16.msra.mxu1 %v3262_v24  ;;  %v3645_v6 = vld [vmem:[#allocation5 + $0x6c8] sm:$0xf]  ;;  %v3390_v11 = vor.u32 %v4208_v5, %v3389_v4  ;;  %v4228_v4 = vld [vmem:[#allocation5 + $0x58c] sm:$0xf] }
  0x77   :  { %1740 = vmatmul.bf16.vlgmr.msrb.gmra.mxu2 %v4564_v9  ;;  %v4272_v7 = vld [vmem:[#allocation5 + $0x6e4] sm:$0xf0]  ;;  %v3487_v5 = vld [vmem:[#allocation5 + $0x5a8] sm:$0xf0] }
  0x78   :  { %1788 = vmatpush.bf16.msra.mxu2 %v3518_v25  ;;  %1761 = vmatpush.bf16.msra.mxu0 %v2974_v36  ;;  %v2845_v12 = vld [vmem:[#allocation5 + $0x88] sm:$0xf]  ;;  %v3646_v15 = vor.u32 %v4272_v7, %v3645_v6  ;;  %v4292_v6 = vld [vmem:[#allocation5 + $0x78c] sm:$0xf] }
  0x79   :  { %1754 = vmatmul.bf16.vlgmr.msrb.gmra.mxu3 %v4569_v20  ;;  %v4072_v13 = vld [vmem:[#allocation5 + $0xa4] sm:$0xf0]  ;;  %v3743_v7 = vld [vmem:[#allocation5 + $0x7a8] sm:$0xf0] }
  0x7a   :  { %1802 = vmatpush.bf16.msra.mxu3 %v3774_v29  ;;  %1775 = vmatpush.bf16.msra.mxu1 %v3230_v37  ;;  %v3101_v14 = vld [vmem:[#allocation5 + $0x288] sm:$0xf]  ;;  %v2846_v23 = vor.u32 %v4072_v13, %v2845_v12  ;;  %v4092_v12 = vld [vmem:[#allocation5 + $0x14c] sm:$0xf] }
  0x7b   :  { %v4136_v17 = vld [vmem:[#allocation5 + $0x2a4] sm:$0xf0]  ;;  %v2943_v13 = vld [vmem:[#allocation5 + $0x168] sm:$0xf0] }
  0x7c   :  { %1789 = vmatpush.bf16.msra.mxu2 %v3486_v38  ;;  %1762 = vmatpush.bf16.msra.mxu0 %v2942_v48  ;;  %v3357_v18 = vld [vmem:[#allocation5 + $0x488] sm:$0xf]  ;;  %v3102_v24 = vor.u32 %v4136_v17, %v3101_v14  ;;  %v4108_v48 = vld [vmem:[#allocation5 + $0x1cc] sm:$0xf] }
  0x7d   :  { %v4200_v19 = vld [vmem:[#allocation5 + $0x4a4] sm:$0xf0]  ;;  %v4156_v14 = vld [vmem:[#allocation5 + $0x34c] sm:$0xf] }
  0x7e   :  { %1803 = vmatpush.bf16.msra.mxu3 %v3742_v42  ;;  %1776 = vmatpush.bf16.msra.mxu1 %v3198_v49  ;;  %v3613_v21 = vld [vmem:[#allocation5 + $0x688] sm:$0xf]  ;;  %v3358_v25 = vor.u32 %v4200_v19, %v3357_v18  ;;  %v3007_v49 = vld [vmem:[#allocation5 + $0x1e8] sm:$0xf0] }
  0x7f   :  { %v4264_v22 = vld [vmem:[#allocation5 + $0x6a4] sm:$0xf0]  ;;  %v3199_v17 = vld [vmem:[#allocation5 + $0x368] sm:$0xf0] }
  0x80   :  { %1790 = vmatpush.bf16.msra.mxu2 %v3454_v50  ;;  %1763 = vmatpush.bf16.msra.mxu0 %v2910_v60  ;;  %v2813_v26 = vld [vmem:[#allocation5 + $0x48] sm:$0xf]  ;;  %v3614_v29 = vor.u32 %v4264_v22, %v3613_v21  ;;  %v4172_v50 = vld [vmem:[#allocation5 + $0x3cc] sm:$0xf]  ;;  %v3010_v60 = vor.u32 %v4108_v48, %v3007_v49 }
  0x81   :  { %v4064_v27 = vld [vmem:[#allocation5 + $0x64] sm:$0xf0]  ;;  %v4220_v18 = vld [vmem:[#allocation5 + $0x54c] sm:$0xf] }
  0x82   :  { %1804 = vmatpush.bf16.msra.mxu3 %v3710_v54  ;;  %1777 = vmatpush.bf16.msra.mxu1 %v3166_v61  ;;  %v3069_v28 = vld [vmem:[#allocation5 + $0x248] sm:$0xf]  ;;  %v2814_v36 = vor.u32 %v4064_v27, %v2813_v26  ;;  %v3519_v54 = vld [vmem:[#allocation5 + $0x5e8] sm:$0xf0]  ;;  %v3266_v61 = vor.u32 %v4172_v50, %v3263_v52 }
  0x83   :  { %v4128_v30 = vld [vmem:[#allocation5 + $0x264] sm:$0xf0]  ;;  %v3455_v19 = vld [vmem:[#allocation5 + $0x568] sm:$0xf0] }
  0x84   :  { %1791 = vmatpush.bf16.msra.mxu2 %v3422_v62  ;;  %1764 = vmatpush.bf16.msra.mxu0 %v2878_v8  ;;  %v3325_v31 = vld [vmem:[#allocation5 + $0x448] sm:$0xf]  ;;  %v3070_v39 = vor.u32 %v4128_v30, %v3069_v28  ;;  %v3522_v62 = vor.u32 %v4236_v53, %v3519_v54  ;;  %v2978_v8 = vor.u32 %v4100_v63, %v2975_v0  ;;  %v4284_v21 = vld [vmem:[#allocation5 + $0x74c] sm:$0xf] }
  0x85   :  { %v4192_v32 = vld [vmem:[#allocation5 + $0x464] sm:$0xf0]  ;;  %v3711_v22 = vld [vmem:[#allocation5 + $0x768] sm:$0xf0] }
  0x86   :  { %1805 = vmatpush.bf16.msra.mxu3 %v3678_v2  ;;  %1778 = vmatpush.bf16.msra.mxu1 %v3134_v10  ;;  %v3581_v34 = vld [vmem:[#allocation5 + $0x648] sm:$0xf]  ;;  %v3326_v40 = vor.u32 %v4192_v32, %v3325_v31  ;;  %v3778_v2 = vor.u32 %v4300_v57, %v3775_v58  ;;  %v3234_v10 = vor.u32 %v4164_v1, %v3231_v3  ;;  %v4084_v26 = vld [vmem:[#allocation5 + $0x10c] sm:$0xf] }
  0x87   :  { %v4256_v35 = vld [vmem:[#allocation5 + $0x664] sm:$0xf0]  ;;  %v2911_v27 = vld [vmem:[#allocation5 + $0x128] sm:$0xf0] }
  0x88   :  { %1792 = vmatpush.bf16.msra.mxu2 %v3390_v11  ;;  %1765 = vmatpush.bf16.msra.mxu0 %v2846_v23  ;;  %v2781_v37 = vld [vmem:[#allocation5 + $0x8] sm:$0xf]  ;;  %v3582_v44 = vor.u32 %v4256_v35, %v3581_v34  ;;  %v3490_v11 = vor.u32 %v4228_v4, %v3487_v5  ;;  %v2946_v23 = vor.u32 %v4092_v12, %v2943_v13  ;;  %v4148_v28 = vld [vmem:[#allocation5 + $0x30c] sm:$0xf] }
  0x89   :  { %v4056_v38 = vld [vmem:[#allocation5 + $0x24] sm:$0xf0]  ;;  %v3167_v30 = vld [vmem:[#allocation5 + $0x328] sm:$0xf0] }
  0x8a   :  { %1806 = vmatpush.bf16.msra.mxu3 %v3646_v15  ;;  %1779 = vmatpush.bf16.msra.mxu1 %v3102_v24  ;;  %v3037_v41 = vld [vmem:[#allocation5 + $0x208] sm:$0xf]  ;;  %v2782_v51 = vor.u32 %v4056_v38, %v2781_v37  ;;  %v3746_v15 = vor.u32 %v4292_v6, %v3743_v7  ;;  %v3202_v24 = vor.u32 %v4156_v14, %v3199_v17  ;;  %v4212_v31 = vld [vmem:[#allocation5 + $0x50c] sm:$0xf] }
  0x8b   :  { %v4120_v42 = vld [vmem:[#allocation5 + $0x224] sm:$0xf0]  ;;  %v3423_v32 = vld [vmem:[#allocation5 + $0x528] sm:$0xf0]  ;;  %v3170_v37 = vor.u32 %v4148_v28, %v3167_v30  ;;  %v3525_v28 = vld [vmem:[#allocation5 + $0x5d0] sm:$0xf] }
  0x8c   :  { %1793 = vmatpush.bf16.msra.mxu2 %v3358_v25  ;;  %v3293_v43 = vld [vmem:[#allocation5 + $0x408] sm:$0xf]  ;;  %1766 = vmatpush.bf16.msra.mxu0 %v2814_v36  ;;  %v3038_v55 = vor.u32 %v4120_v42, %v3037_v41  ;;  %v3458_v25 = vor.u32 %v4220_v18, %v3455_v19  ;;  %v4276_v34 = vld [vmem:[#allocation5 + $0x70c] sm:$0xf]  ;;  %v2914_v36 = vor.u32 %v4084_v26, %v2911_v27  ;;  %v4177_v27 = vld [vmem:[#allocation5 + $0x3ec] sm:$0xf0] }
  0x8d   :  { %v4184_v45 = vld [vmem:[#allocation5 + $0x424] sm:$0xf0]  ;;  %v3679_v35 = vld [vmem:[#allocation5 + $0x728] sm:$0xf0]  ;;  %v3426_v38 = vor.u32 %v4212_v31, %v3423_v32  ;;  %v3781_v32 = vld [vmem:[#allocation5 + $0x7d0] sm:$0xf] }
  0x8e   :  { %1807 = vmatpush.bf16.msra.mxu3 %v3614_v29  ;;  %v3549_v46 = vld [vmem:[#allocation5 + $0x608] sm:$0xf]  ;;  %1780 = vmatpush.bf16.msra.mxu1 %v3070_v39  ;;  %v3294_v56 = vor.u32 %v4184_v45, %v3293_v43  ;;  %v3714_v29 = vor.u32 %v4284_v21, %v3711_v22  ;;  %v4076_v39 = vld [vmem:[#allocation5 + $0xcc] sm:$0xf]  ;;  %v3682_v42 = vor.u32 %v4276_v34, %v3679_v35  ;;  %v4305_v34 = vld [vmem:[#allocation5 + $0x7ec] sm:$0xf0] }
  0x8f   :  { %v4248_v47 = vld [vmem:[#allocation5 + $0x624] sm:$0xf0]  ;;  %v4140_v41 = vld [vmem:[#allocation5 + $0x2cc] sm:$0xf] }
  0x90   :  { %1794 = vmatpush.bf16.msra.mxu2 %v3326_v40  ;;  %v3550_v59 = vor.u32 %v4248_v47, %v3549_v46  ;;  %1767 = vmatpush.bf16.msra.mxu0 %v2782_v51  ;;  %v2879_v40 = vld [vmem:[#allocation5 + $0xe8] sm:$0xf0] }
  0x91   :  { %v3135_v43 = vld [vmem:[#allocation5 + $0x2e8] sm:$0xf0]  ;;  %v2882_v48 = vor.u32 %v4076_v39, %v2879_v40  ;;  %v2981_v39 = vld [vmem:[#allocation5 + $0x190] sm:$0xf] }
  0x92   :  { %1808 = vmatpush.bf16.msra.mxu3 %v3582_v44  ;;  %1781 = vmatpush.bf16.msra.mxu1 %v3038_v55  ;;  %v4204_v44 = vld [vmem:[#allocation5 + $0x4cc] sm:$0xf]  ;;  %v3138_v49 = vor.u32 %v4140_v41, %v3135_v43  ;;  %v4105_v40 = vld [vmem:[#allocation5 + $0x1ac] sm:$0xf0] }
  0x93   :  { %1768 = vmatmul.bf16.vlgmr.msra.gmra.mxu0 %v4566_v16  ;;  %v3391_v45 = vld [vmem:[#allocation5 + $0x4e8] sm:$0xf0]  ;;  %v3237_v41 = vld [vmem:[#allocation5 + $0x390] sm:$0xf] }
  0x94   :  { %1795 = vmatpush.bf16.msra.mxu2 %v3294_v56  ;;  %1816 = vmatpush.bf16.msrb.mxu0 %v3010_v60  ;;  %v4268_v46 = vld [vmem:[#allocation5 + $0x6cc] sm:$0xf]  ;;  %v3394_v50 = vor.u32 %v4204_v44, %v3391_v45  ;;  %v4169_v43 = vld [vmem:[#allocation5 + $0x3ac] sm:$0xf0] }
  0x95   :  { %1782 = vmatmul.bf16.vlgmr.msra.gmra.mxu1 %v4572_v33  ;;  %v3647_v47 = vld [vmem:[#allocation5 + $0x6e8] sm:$0xf0]  ;;  %v3493_v44 = vld [vmem:[#allocation5 + $0x590] sm:$0xf] }
  0x96   :  { %1809 = vmatpush.bf16.msra.mxu3 %v3550_v59  ;;  %1830 = vmatpush.bf16.msrb.mxu1 %v3266_v61  ;;  %v4068_v51 = vld [vmem:[#allocation5 + $0x8c] sm:$0xf]  ;;  %v3650_v54 = vor.u32 %v4268_v46, %v3647_v47  ;;  %v4233_v45 = vld [vmem:[#allocation5 + $0x5ac] sm:$0xf0] }
  0x97   :  { %1796 = vmatmul.bf16.vlgmr.msra.gmra.mxu2 %v4564_v9  ;;  %v2847_v52 = vld [vmem:[#allocation5 + $0xa8] sm:$0xf0]  ;;  %v3749_v46 = vld [vmem:[#allocation5 + $0x790] sm:$0xf] }
  0x98   :  { %1844 = vmatpush.bf16.msrb.mxu2 %v3522_v62  ;;  %1817 = vmatpush.bf16.msrb.mxu0 %v2978_v8  ;;  %v4132_v53 = vld [vmem:[#allocation5 + $0x28c] sm:$0xf]  ;;  %v2850_v60 = vor.u32 %v4068_v51, %v2847_v52  ;;  %v4297_v47 = vld [vmem:[#allocation5 + $0x7ac] sm:$0xf0] }
  0x99   :  { %1810 = vmatmul.bf16.vlgmr.msra.gmra.mxu3 %v4569_v20  ;;  %v3103_v55 = vld [vmem:[#allocation5 + $0x2a8] sm:$0xf0]  ;;  %v2949_v51 = vld [vmem:[#allocation5 + $0x150] sm:$0xf] }
  0x9a   :  { %1858 = vmatpush.bf16.msrb.mxu3 %v3778_v2  ;;  %1831 = vmatpush.bf16.msrb.mxu1 %v3234_v10  ;;  %v4196_v56 = vld [vmem:[#allocation5 + $0x48c] sm:$0xf]  ;;  %v3106_v61 = vor.u32 %v4132_v53, %v3103_v55  ;;  %v4097_v52 = vld [vmem:[#allocation5 + $0x16c] sm:$0xf0] }
  0x9b   :  { %v3359_v57 = vld [vmem:[#allocation5 + $0x4a8] sm:$0xf0]  ;;  %v3205_v53 = vld [vmem:[#allocation5 + $0x350] sm:$0xf] }
  0x9c   :  { %1845 = vmatpush.bf16.msrb.mxu2 %v3490_v11  ;;  %1818 = vmatpush.bf16.msrb.mxu0 %v2946_v23  ;;  %v4260_v58 = vld [vmem:[#allocation5 + $0x68c] sm:$0xf]  ;;  %v3362_v62 = vor.u32 %v4196_v56, %v3359_v57  ;;  %v3013_v23 = vld [vmem:[#allocation5 + $0x1d0] sm:$0xf] }
  0x9d   :  { %v3615_v59 = vld [vmem:[#allocation5 + $0x6a8] sm:$0xf0]  ;;  %v4161_v55 = vld [vmem:[#allocation5 + $0x36c] sm:$0xf0] }
  0x9e   :  { %1859 = vmatpush.bf16.msrb.mxu3 %v3746_v15  ;;  %1832 = vmatpush.bf16.msrb.mxu1 %v3202_v24  ;;  %v4060_v63 = vld [vmem:[#allocation5 + $0x4c] sm:$0xf]  ;;  %v3618_v2 = vor.u32 %v4260_v58, %v3615_v59  ;;  %v4113_v24 = vld [vmem:[#allocation5 + $0x1ec] sm:$0xf0] }
  0x9f   :  { %v2815_v0 = vld [vmem:[#allocation5 + $0x68] sm:$0xf0]  ;;  %v3461_v56 = vld [vmem:[#allocation5 + $0x550] sm:$0xf] }
  0xa0   :  { %1846 = vmatpush.bf16.msrb.mxu2 %v3458_v25  ;;  %1819 = vmatpush.bf16.msrb.mxu0 %v2914_v36  ;;  %v4124_v1 = vld [vmem:[#allocation5 + $0x24c] sm:$0xf]  ;;  %v2818_v8 = vor.u32 %v4060_v63, %v2815_v0  ;;  %v3269_v25 = vld [vmem:[#allocation5 + $0x3d0] sm:$0xf]  ;;  %v3014_v36 = vor.u32 %v4113_v24, %v3013_v23 }
  0xa1   :  { %v3071_v3 = vld [vmem:[#allocation5 + $0x268] sm:$0xf0]  ;;  %v4225_v57 = vld [vmem:[#allocation5 + $0x56c] sm:$0xf0] }
  0xa2   :  { %1860 = vmatpush.bf16.msrb.mxu3 %v3714_v29  ;;  %1833 = vmatpush.bf16.msrb.mxu1 %v3170_v37  ;;  %v4188_v4 = vld [vmem:[#allocation5 + $0x44c] sm:$0xf]  ;;  %v3074_v12 = vor.u32 %v4124_v1, %v3071_v3  ;;  %v4241_v29 = vld [vmem:[#allocation5 + $0x5ec] sm:$0xf0]  ;;  %v3270_v37 = vor.u32 %v4177_v27, %v3269_v25 }
  0xa3   :  { %v3327_v5 = vld [vmem:[#allocation5 + $0x468] sm:$0xf0]  ;;  %v3717_v58 = vld [vmem:[#allocation5 + $0x750] sm:$0xf] }
  0xa4   :  { %1847 = vmatpush.bf16.msrb.mxu2 %v3426_v38  ;;  %1820 = vmatpush.bf16.msrb.mxu0 %v2882_v48  ;;  %v4252_v6 = vld [vmem:[#allocation5 + $0x64c] sm:$0xf]  ;;  %v3330_v13 = vor.u32 %v4188_v4, %v3327_v5  ;;  %v3526_v38 = vor.u32 %v4241_v29, %v3525_v28  ;;  %v2982_v48 = vor.u32 %v4105_v40, %v2981_v39  ;;  %v4289_v59 = vld [vmem:[#allocation5 + $0x76c] sm:$0xf0] }
  0xa5   :  { %v3583_v7 = vld [vmem:[#allocation5 + $0x668] sm:$0xf0]  ;;  %v2917_v63 = vld [vmem:[#allocation5 + $0x110] sm:$0xf] }
  0xa6   :  { %1861 = vmatpush.bf16.msrb.mxu3 %v3682_v42  ;;  %1834 = vmatpush.bf16.msrb.mxu1 %v3138_v49  ;;  %v4052_v10 = vld [vmem:[#allocation5 + $0xc] sm:$0xf]  ;;  %v3586_v18 = vor.u32 %v4252_v6, %v3583_v7  ;;  %v3782_v42 = vor.u32 %v4305_v34, %v3781_v32  ;;  %v3238_v49 = vor.u32 %v4169_v43, %v3237_v41  ;;  %v4089_v0 = vld [vmem:[#allocation5 + $0x12c] sm:$0xf0] }
  0xa7   :  { %v2783_v11 = vld [vmem:[#allocation5 + $0x28] sm:$0xf0]  ;;  %v3173_v1 = vld [vmem:[#allocation5 + $0x310] sm:$0xf] }
  0xa8   :  { %1848 = vmatpush.bf16.msrb.mxu2 %v3394_v50  ;;  %1821 = vmatpush.bf16.msrb.mxu0 %v2850_v60  ;;  %v4116_v14 = vld [vmem:[#allocation5 + $0x20c] sm:$0xf]  ;;  %v2786_v26 = vor.u32 %v4052_v10, %v2783_v11  ;;  %v3494_v50 = vor.u32 %v4233_v45, %v3493_v44  ;;  %v2950_v60 = vor.u32 %v4097_v52, %v2949_v51  ;;  %v4153_v3 = vld [vmem:[#allocation5 + $0x32c] sm:$0xf0] }
  0xa9   :  { %v3039_v15 = vld [vmem:[#allocation5 + $0x228] sm:$0xf0]  ;;  %v3429_v4 = vld [vmem:[#allocation5 + $0x510] sm:$0xf]  ;;  %v3174_v10 = vor.u32 %v4153_v3, %v3173_v1  ;;  %v4237_v1 = vld [vmem:[#allocation5 + $0x5d4] sm:$0xf] }
  0xaa   :  { %1862 = vmatpush.bf16.msrb.mxu3 %v3650_v54  ;;  %1835 = vmatpush.bf16.msrb.mxu1 %v3106_v61  ;;  %v4180_v17 = vld [vmem:[#allocation5 + $0x40c] sm:$0xf]  ;;  %v3042_v30 = vor.u32 %v4116_v14, %v3039_v15  ;;  %v3750_v54 = vor.u32 %v4297_v47, %v3749_v46  ;;  %v3206_v61 = vor.u32 %v4161_v55, %v3205_v53  ;;  %v4217_v5 = vld [vmem:[#allocation5 + $0x52c] sm:$0xf0] }
  0xab   :  { %v3295_v19 = vld [vmem:[#allocation5 + $0x428] sm:$0xf0]  ;;  %v3685_v6 = vld [vmem:[#allocation5 + $0x710] sm:$0xf]  ;;  %v3430_v11 = vor.u32 %v4217_v5, %v3429_v4  ;;  %v4301_v5 = vld [vmem:[#allocation5 + $0x7d4] sm:$0xf] }
  0xac   :  { %1849 = vmatpush.bf16.msrb.mxu2 %v3362_v62  ;;  %v4244_v21 = vld [vmem:[#allocation5 + $0x60c] sm:$0xf]  ;;  %1822 = vmatpush.bf16.msrb.mxu0 %v2818_v8  ;;  %v3298_v31 = vor.u32 %v4180_v17, %v3295_v19  ;;  %v3462_v62 = vor.u32 %v4225_v57, %v3461_v56  ;;  %v4281_v7 = vld [vmem:[#allocation5 + $0x72c] sm:$0xf0]  ;;  %v2918_v8 = vor.u32 %v4089_v0, %v2917_v63  ;;  %v3271_v0 = vld [vmem:[#allocation5 + $0x3f0] sm:$0xf0] }
  0xad   :  { %v3551_v22 = vld [vmem:[#allocation5 + $0x628] sm:$0xf0]  ;;  %v3141_v14 = vld [vmem:[#allocation5 + $0x2d0] sm:$0xf]  ;;  %v3686_v15 = vor.u32 %v4281_v7, %v3685_v6  ;;  %v3783_v6 = vld [vmem:[#allocation5 + $0x7f0] sm:$0xf0] }
  0xae   :  { %1863 = vmatpush.bf16.msrb.mxu3 %v3618_v2  ;;  %1836 = vmatpush.bf16.msrb.mxu1 %v3074_v12  ;;  %v3554_v35 = vor.u32 %v4244_v21, %v3551_v22  ;;  %v3718_v2 = vor.u32 %v4289_v59, %v3717_v58  ;;  %v2885_v12 = vld [vmem:[#allocation5 + $0xd0] sm:$0xf] }
  0xaf   :  { %v4145_v17 = vld [vmem:[#allocation5 + $0x2ec] sm:$0xf0] }
  0xb0   :  { %1850 = vmatpush.bf16.msrb.mxu2 %v3330_v13  ;;  %1823 = vmatpush.bf16.msrb.mxu0 %v2786_v26  ;;  %v4081_v13 = vld [vmem:[#allocation5 + $0xec] sm:$0xf0]  ;;  %v3142_v24 = vor.u32 %v4145_v17, %v3141_v14  ;;  %v4165_v14 = vld [vmem:[#allocation5 + $0x394] sm:$0xf] }
  0xb1   :  { %v4209_v19 = vld [vmem:[#allocation5 + $0x4ec] sm:$0xf0]  ;;  %v2886_v23 = vor.u32 %v4081_v13, %v2885_v12  ;;  %v4101_v12 = vld [vmem:[#allocation5 + $0x194] sm:$0xf] }
  0xb2   :  { %1864 = vmatpush.bf16.msrb.mxu3 %v3586_v18  ;;  %1837 = vmatpush.bf16.msrb.mxu1 %v3042_v30  ;;  %v3397_v18 = vld [vmem:[#allocation5 + $0x4d0] sm:$0xf]  ;;  %v2983_v13 = vld [vmem:[#allocation5 + $0x1b0] sm:$0xf0] }
  0xb3   :  { %1824 = vmatmul.bf16.vlgmr.msrb.gmra.mxu0 %v4566_v16  ;;  %v3653_v21 = vld [vmem:[#allocation5 + $0x6d0] sm:$0xf]  ;;  %v3398_v25 = vor.u32 %v4209_v19, %v3397_v18  ;;  %v3239_v17 = vld [vmem:[#allocation5 + $0x3b0] sm:$0xf0] }
  0xb4   :  { %1851 = vmatpush.bf16.msrb.mxu2 %v3298_v31  ;;  %1872 = vmatpush.bf16.msra.mxu0 %v3014_v36  ;;  %v4273_v22 = vld [vmem:[#allocation5 + $0x6ec] sm:$0xf0]  ;;  %v4229_v18 = vld [vmem:[#allocation5 + $0x594] sm:$0xf] }
  0xb5   :  { %1838 = vmatmul.bf16.vlgmr.msrb.gmra.mxu1 %v4572_v33  ;;  %v2853_v26 = vld [vmem:[#allocation5 + $0x90] sm:$0xf]  ;;  %v3654_v29 = vor.u32 %v4273_v22, %v3653_v21  ;;  %v3495_v19 = vld [vmem:[#allocation5 + $0x5b0] sm:$0xf0] }
  0xb6   :  { %1865 = vmatpush.bf16.msrb.mxu3 %v3554_v35  ;;  %1886 = vmatpush.bf16.msra.mxu1 %v3270_v37  ;;  %v4073_v27 = vld [vmem:[#allocation5 + $0xac] sm:$0xf0]  ;;  %v4293_v21 = vld [vmem:[#allocation5 + $0x794] sm:$0xf] }
  0xb7   :  { %1852 = vmatmul.bf16.vlgmr.msrb.gmra.mxu2 %v4564_v9  ;;  %v3109_v28 = vld [vmem:[#allocation5 + $0x290] sm:$0xf]  ;;  %v2854_v36 = vor.u32 %v4073_v27, %v2853_v26  ;;  %v3751_v22 = vld [vmem:[#allocation5 + $0x7b0] sm:$0xf0] }
  0xb8   :  { %1900 = vmatpush.bf16.msra.mxu2 %v3526_v38  ;;  %1873 = vmatpush.bf16.msra.mxu0 %v2982_v48  ;;  %v4137_v30 = vld [vmem:[#allocation5 + $0x2ac] sm:$0xf0]  ;;  %v4093_v26 = vld [vmem:[#allocation5 + $0x154] sm:$0xf] }
  0xb9   :  { %1866 = vmatmul.bf16.vlgmr.msrb.gmra.mxu3 %v4569_v20  ;;  %v3365_v31 = vld [vmem:[#allocation5 + $0x490] sm:$0xf]  ;;  %v3110_v37 = vor.u32 %v4137_v30, %v3109_v28  ;;  %v2951_v27 = vld [vmem:[#allocation5 + $0x170] sm:$0xf0] }
  0xba   :  { %1914 = vmatpush.bf16.msra.mxu3 %v3782_v42  ;;  %1887 = vmatpush.bf16.msra.mxu1 %v3238_v49  ;;  %v4201_v32 = vld [vmem:[#allocation5 + $0x4ac] sm:$0xf0]  ;;  %v4157_v28 = vld [vmem:[#allocation5 + $0x354] sm:$0xf] }
  0xbb   :  { %v3621_v34 = vld [vmem:[#allocation5 + $0x690] sm:$0xf]  ;;  %v3366_v38 = vor.u32 %v4201_v32, %v3365_v31  ;;  %v3207_v30 = vld [vmem:[#allocation5 + $0x370] sm:$0xf0] }
  0xbc   :  { %1901 = vmatpush.bf16.msra.mxu2 %v3494_v50  ;;  %1874 = vmatpush.bf16.msra.mxu0 %v2950_v60  ;;  %v4265_v35 = vld [vmem:[#allocation5 + $0x6ac] sm:$0xf0]  ;;  %v4109_v60 = vld [vmem:[#allocation5 + $0x1d4] sm:$0xf] }
  0xbd   :  { %v2821_v39 = vld [vmem:[#allocation5 + $0x50] sm:$0xf]  ;;  %v3622_v42 = vor.u32 %v4265_v35, %v3621_v34  ;;  %v4221_v31 = vld [vmem:[#allocation5 + $0x554] sm:$0xf] }
  0xbe   :  { %1915 = vmatpush.bf16.msra.mxu3 %v3750_v54  ;;  %1888 = vmatpush.bf16.msra.mxu1 %v3206_v61  ;;  %v4065_v40 = vld [vmem:[#allocation5 + $0x6c] sm:$0xf0]  ;;  %v3015_v61 = vld [vmem:[#allocation5 + $0x1f0] sm:$0xf0] }
  0xbf   :  { %v3077_v41 = vld [vmem:[#allocation5 + $0x250] sm:$0xf]  ;;  %v2822_v48 = vor.u32 %v4065_v40, %v2821_v39  ;;  %v3463_v32 = vld [vmem:[#allocation5 + $0x570] sm:$0xf0] }
  0xc0   :  { %1902 = vmatpush.bf16.msra.mxu2 %v3462_v62  ;;  %1875 = vmatpush.bf16.msra.mxu0 %v2918_v8  ;;  %v4129_v43 = vld [vmem:[#allocation5 + $0x26c] sm:$0xf0]  ;;  %v4173_v62 = vld [vmem:[#allocation5 + $0x3d4] sm:$0xf]  ;;  %v3018_v8 = vor.u32 %v4109_v60, %v3015_v61 }
  0xc1   :  { %v3333_v44 = vld [vmem:[#allocation5 + $0x450] sm:$0xf]  ;;  %v3078_v51 = vor.u32 %v4129_v43, %v3077_v41  ;;  %v4285_v34 = vld [vmem:[#allocation5 + $0x754] sm:$0xf] }
  0xc2   :  { %1916 = vmatpush.bf16.msra.mxu3 %v3718_v2  ;;  %1889 = vmatpush.bf16.msra.mxu1 %v3174_v10  ;;  %v4193_v45 = vld [vmem:[#allocation5 + $0x46c] sm:$0xf0]  ;;  %v3527_v2 = vld [vmem:[#allocation5 + $0x5f0] sm:$0xf0]  ;;  %v3274_v10 = vor.u32 %v4173_v62, %v3271_v0 }
  0xc3   :  { %v3589_v46 = vld [vmem:[#allocation5 + $0x650] sm:$0xf]  ;;  %v3334_v52 = vor.u32 %v4193_v45, %v3333_v44  ;;  %v3719_v35 = vld [vmem:[#allocation5 + $0x770] sm:$0xf0] }
  0xc4   :  { %1903 = vmatpush.bf16.msra.mxu2 %v3430_v11  ;;  %1876 = vmatpush.bf16.msra.mxu0 %v2886_v23  ;;  %v4257_v47 = vld [vmem:[#allocation5 + $0x66c] sm:$0xf0]  ;;  %v3530_v11 = vor.u32 %v4237_v1, %v3527_v2  ;;  %v2986_v23 = vor.u32 %v4101_v12, %v2983_v13  ;;  %v4085_v39 = vld [vmem:[#allocation5 + $0x114] sm:$0xf] }
  0xc5   :  { %v2789_v49 = vld [vmem:[#allocation5 + $0x10] sm:$0xf]  ;;  %v3590_v56 = vor.u32 %v4257_v47, %v3589_v46  ;;  %v2919_v40 = vld [vmem:[#allocation5 + $0x130] sm:$0xf0] }
  0xc6   :  { %1917 = vmatpush.bf16.msra.mxu3 %v3686_v15  ;;  %1890 = vmatpush.bf16.msra.mxu1 %v3142_v24  ;;  %v4057_v50 = vld [vmem:[#allocation5 + $0x2c] sm:$0xf0]  ;;  %v3786_v15 = vor.u32 %v4301_v5, %v3783_v6  ;;  %v3242_v24 = vor.u32 %v4165_v14, %v3239_v17  ;;  %v4149_v41 = vld [vmem:[#allocation5 + $0x314] sm:$0xf] }
  0xc7   :  { %v3045_v53 = vld [vmem:[#allocation5 + $0x210] sm:$0xf]  ;;  %v2790_v63 = vor.u32 %v4057_v50, %v2789_v49  ;;  %v3175_v43 = vld [vmem:[#allocation5 + $0x330] sm:$0xf0] }
  0xc8   :  { %1904 = vmatpush.bf16.msra.mxu2 %v3398_v25  ;;  %1877 = vmatpush.bf16.msra.mxu0 %v2854_v36  ;;  %v4121_v54 = vld [vmem:[#allocation5 + $0x22c] sm:$0xf0]  ;;  %v3498_v25 = vor.u32 %v4229_v18, %v3495_v19  ;;  %v2954_v36 = vor.u32 %v4093_v26, %v2951_v27  ;;  %v4213_v44 = vld [vmem:[#allocation5 + $0x514] sm:$0xf]  ;;  %v3178_v49 = vor.u32 %v4149_v41, %v3175_v43  ;;  %v3533_v41 = vld [vmem:[#allocation5 + $0x5d8] sm:$0xf] }
  0xc9   :  { %v3301_v55 = vld [vmem:[#allocation5 + $0x410] sm:$0xf]  ;;  %v3046_v3 = vor.u32 %v4121_v54, %v3045_v53  ;;  %v3431_v45 = vld [vmem:[#allocation5 + $0x530] sm:$0xf0] }
  0xca   :  { %1918 = vmatpush.bf16.msra.mxu3 %v3654_v29  ;;  %1891 = vmatpush.bf16.msra.mxu1 %v3110_v37  ;;  %v4185_v57 = vld [vmem:[#allocation5 + $0x42c] sm:$0xf0]  ;;  %v3754_v29 = vor.u32 %v4293_v21, %v3751_v22  ;;  %v3210_v37 = vor.u32 %v4157_v28, %v3207_v30  ;;  %v4277_v46 = vld [vmem:[#allocation5 + $0x714] sm:$0xf]  ;;  %v3434_v50 = vor.u32 %v4213_v44, %v3431_v45  ;;  %v3789_v45 = vld [vmem:[#allocation5 + $0x7d8] sm:$0xf] }
  0xcb   :  { %v3557_v58 = vld [vmem:[#allocation5 + $0x610] sm:$0xf]  ;;  %v3302_v4 = vor.u32 %v4185_v57, %v3301_v55  ;;  %v3687_v47 = vld [vmem:[#allocation5 + $0x730] sm:$0xf0] }
  0xcc   :  { %1905 = vmatpush.bf16.msra.mxu2 %v3366_v38  ;;  %v4249_v59 = vld [vmem:[#allocation5 + $0x62c] sm:$0xf0]  ;;  %1878 = vmatpush.bf16.msra.mxu0 %v2822_v48  ;;  %v3466_v38 = vor.u32 %v4221_v31, %v3463_v32  ;;  %v2922_v48 = vor.u32 %v4085_v39, %v2919_v40  ;;  %v4141_v53 = vld [vmem:[#allocation5 + $0x2d4] sm:$0xf]  ;;  %v3690_v54 = vor.u32 %v4277_v46, %v3687_v47  ;;  %v4178_v40 = vld [vmem:[#allocation5 + $0x3f4] sm:$0xf0] }
  0xcd   :  { %v3558_v7 = vor.u32 %v4249_v59, %v3557_v58  ;;  %v3143_v55 = vld [vmem:[#allocation5 + $0x2f0] sm:$0xf0]  ;;  %v4306_v46 = vld [vmem:[#allocation5 + $0x7f4] sm:$0xf0] }
  0xce   :  { %1919 = vmatpush.bf16.msra.mxu3 %v3622_v42  ;;  %1892 = vmatpush.bf16.msra.mxu1 %v3078_v51  ;;  %v3722_v42 = vor.u32 %v4285_v34, %v3719_v35  ;;  %v4077_v51 = vld [vmem:[#allocation5 + $0xd4] sm:$0xf]  ;;  %v3146_v61 = vor.u32 %v4141_v53, %v3143_v55  ;;  %v3245_v53 = vld [vmem:[#allocation5 + $0x398] sm:$0xf] }
  0xcf   :  { %v3399_v57 = vld [vmem:[#allocation5 + $0x4f0] sm:$0xf0]  ;;  %v4170_v55 = vld [vmem:[#allocation5 + $0x3b4] sm:$0xf0] }
  0xd0   :  { %1906 = vmatpush.bf16.msra.mxu2 %v3334_v52  ;;  %1879 = vmatpush.bf16.msra.mxu0 %v2790_v63  ;;  %v2887_v52 = vld [vmem:[#allocation5 + $0xf0] sm:$0xf0] }
  0xd1   :  { %v4269_v58 = vld [vmem:[#allocation5 + $0x6d4] sm:$0xf]  ;;  %v2890_v60 = vor.u32 %v4077_v51, %v2887_v52  ;;  %v2989_v51 = vld [vmem:[#allocation5 + $0x198] sm:$0xf] }
  0xd2   :  { %1920 = vmatpush.bf16.msra.mxu3 %v3590_v56  ;;  %1893 = vmatpush.bf16.msra.mxu1 %v3046_v3  ;;  %v4205_v56 = vld [vmem:[#allocation5 + $0x4d4] sm:$0xf]  ;;  %v4106_v52 = vld [vmem:[#allocation5 + $0x1b4] sm:$0xf0] }
  0xd3   :  { %1880 = vmatmul.bf16.vlgmr.msra.gmra.mxu0 %v4566_v16  ;;  %v3655_v59 = vld [vmem:[#allocation5 + $0x6f0] sm:$0xf0]  ;;  %v3402_v62 = vor.u32 %v4205_v56, %v3399_v57  ;;  %v3501_v56 = vld [vmem:[#allocation5 + $0x598] sm:$0xf] }
  0xd4   :  { %1907 = vmatpush.bf16.msra.mxu2 %v3302_v4  ;;  %1928 = vmatpush.bf16.msrb.mxu0 %v3018_v8  ;;  %v4069_v63 = vld [vmem:[#allocation5 + $0x94] sm:$0xf]  ;;  %v3658_v2 = vor.u32 %v4269_v58, %v3655_v59  ;;  %v4234_v57 = vld [vmem:[#allocation5 + $0x5b4] sm:$0xf0] }
  0xd5   :  { %1894 = vmatmul.bf16.vlgmr.msra.gmra.mxu1 %v4572_v33  ;;  %v2855_v0 = vld [vmem:[#allocation5 + $0xb0] sm:$0xf0]  ;;  %v3757_v58 = vld [vmem:[#allocation5 + $0x798] sm:$0xf] }
  0xd6   :  { %1921 = vmatpush.bf16.msra.mxu3 %v3558_v7  ;;  %1942 = vmatpush.bf16.msrb.mxu1 %v3274_v10  ;;  %v4133_v1 = vld [vmem:[#allocation5 + $0x294] sm:$0xf]  ;;  %v2858_v8 = vor.u32 %v4069_v63, %v2855_v0  ;;  %v4298_v59 = vld [vmem:[#allocation5 + $0x7b4] sm:$0xf0] }
  0xd7   :  { %1908 = vmatmul.bf16.vlgmr.msra.gmra.mxu2 %v4564_v9  ;;  %v3111_v3 = vld [vmem:[#allocation5 + $0x2b0] sm:$0xf0]  ;;  %v2957_v63 = vld [vmem:[#allocation5 + $0x158] sm:$0xf] }
  0xd8   :  { %1956 = vmatpush.bf16.msrb.mxu2 %v3530_v11  ;;  %1929 = vmatpush.bf16.msrb.mxu0 %v2986_v23  ;;  %v4197_v4 = vld [vmem:[#allocation5 + $0x494] sm:$0xf]  ;;  %v3114_v10 = vor.u32 %v4133_v1, %v3111_v3  ;;  %v4098_v0 = vld [vmem:[#allocation5 + $0x174] sm:$0xf0] }
  0xd9   :  { %1922 = vmatmul.bf16.vlgmr.msra.gmra.mxu3 %v4569_v20  ;;  %v3367_v5 = vld [vmem:[#allocation5 + $0x4b0] sm:$0xf0]  ;;  %v3213_v1 = vld [vmem:[#allocation5 + $0x358] sm:$0xf] }
  0xda   :  { %1970 = vmatpush.bf16.msrb.mxu3 %v3786_v15  ;;  %1943 = vmatpush.bf16.msrb.mxu1 %v3242_v24  ;;  %v4261_v6 = vld [vmem:[#allocation5 + $0x694] sm:$0xf]  ;;  %v3370_v11 = vor.u32 %v4197_v4, %v3367_v5  ;;  %v4162_v3 = vld [vmem:[#allocation5 + $0x374] sm:$0xf0] }
  0xdb   :  { %v3623_v7 = vld [vmem:[#allocation5 + $0x6b0] sm:$0xf0]  ;;  %v3469_v4 = vld [vmem:[#allocation5 + $0x558] sm:$0xf] }
  0xdc   :  { %1957 = vmatpush.bf16.msrb.mxu2 %v3498_v25  ;;  %1930 = vmatpush.bf16.msrb.mxu0 %v2954_v36  ;;  %v4061_v12 = vld [vmem:[#allocation5 + $0x54] sm:$0xf]  ;;  %v3626_v15 = vor.u32 %v4261_v6, %v3623_v7  ;;  %v3021_v36 = vld [vmem:[#allocation5 + $0x1d8] sm:$0xf] }
  0xdd   :  { %v2823_v13 = vld [vmem:[#allocation5 + $0x70] sm:$0xf0]  ;;  %v4226_v5 = vld [vmem:[#allocation5 + $0x574] sm:$0xf0] }
  0xde   :  { %1971 = vmatpush.bf16.msrb.mxu3 %v3754_v29  ;;  %1944 = vmatpush.bf16.msrb.mxu1 %v3210_v37  ;;  %v4125_v14 = vld [vmem:[#allocation5 + $0x254] sm:$0xf]  ;;  %v2826_v23 = vor.u32 %v4061_v12, %v2823_v13  ;;  %v4114_v37 = vld [vmem:[#allocation5 + $0x1f4] sm:$0xf0] }
  0xdf   :  { %v3079_v17 = vld [vmem:[#allocation5 + $0x270] sm:$0xf0]  ;;  %v3725_v6 = vld [vmem:[#allocation5 + $0x758] sm:$0xf] }
  0xe0   :  { %1958 = vmatpush.bf16.msrb.mxu2 %v3466_v38  ;;  %1931 = vmatpush.bf16.msrb.mxu0 %v2922_v48  ;;  %v4189_v18 = vld [vmem:[#allocation5 + $0x454] sm:$0xf]  ;;  %v3082_v26 = vor.u32 %v4125_v14, %v3079_v17  ;;  %v3277_v38 = vld [vmem:[#allocation5 + $0x3d8] sm:$0xf]  ;;  %v3022_v48 = vor.u32 %v4114_v37, %v3021_v36  ;;  %v4596_v36 = vpop.f32.mrf.mxu0 }
  0xe1   :  { %v3335_v19 = vld [vmem:[#allocation5 + $0x470] sm:$0xf0]  ;;  %v4290_v7 = vld [vmem:[#allocation5 + $0x774] sm:$0xf0] }
  0xe2   :  { %1972 = vmatpush.bf16.msrb.mxu3 %v3722_v42  ;;  %1945 = vmatpush.bf16.msrb.mxu1 %v3178_v49  ;;  %v4253_v21 = vld [vmem:[#allocation5 + $0x654] sm:$0xf]  ;;  %v3338_v27 = vor.u32 %v4189_v18, %v3335_v19  ;;  %v4242_v42 = vld [vmem:[#allocation5 + $0x5f4] sm:$0xf0]  ;;  %v3278_v49 = vor.u32 %v4178_v40, %v3277_v38  ;;  %v4598_v38 = vpop.f32.mrf.mxu1 }
  0xe3   :  { %v3591_v22 = vld [vmem:[#allocation5 + $0x670] sm:$0xf0]  ;;  %v2925_v12 = vld [vmem:[#allocation5 + $0x118] sm:$0xf] }
  0xe4   :  { %1959 = vmatpush.bf16.msrb.mxu2 %v3434_v50  ;;  %1932 = vmatpush.bf16.msrb.mxu0 %v2890_v60  ;;  %v4053_v24 = vld [vmem:[#allocation5 + $0x14] sm:$0xf]  ;;  %v3594_v31 = vor.u32 %v4253_v21, %v3591_v22  ;;  %v3534_v50 = vor.u32 %v4242_v42, %v3533_v41  ;;  %v2990_v60 = vor.u32 %v4106_v52, %v2989_v51  ;;  %v4090_v13 = vld [vmem:[#allocation5 + $0x134] sm:$0xf0]  ;;  %v4600_v51 = vpop.f32.mrf.mxu2 }
  0xe5   :  { %v2791_v25 = vld [vmem:[#allocation5 + $0x30] sm:$0xf0]  ;;  %v3181_v14 = vld [vmem:[#allocation5 + $0x318] sm:$0xf] }
  0xe6   :  { %1973 = vmatpush.bf16.msrb.mxu3 %v3690_v54  ;;  %1946 = vmatpush.bf16.msrb.mxu1 %v3146_v61  ;;  %v4117_v28 = vld [vmem:[#allocation5 + $0x214] sm:$0xf]  ;;  %v2794_v39 = vor.u32 %v4053_v24, %v2791_v25  ;;  %v3790_v54 = vor.u32 %v4306_v46, %v3789_v45  ;;  %v3246_v61 = vor.u32 %v4170_v55, %v3245_v53  ;;  %v4154_v17 = vld [vmem:[#allocation5 + $0x334] sm:$0xf0] }
  0xe7   :  { %v3047_v29 = vld [vmem:[#allocation5 + $0x230] sm:$0xf0]  ;;  %v3437_v18 = vld [vmem:[#allocation5 + $0x518] sm:$0xf]  ;;  %v3182_v24 = vor.u32 %v4154_v17, %v3181_v14  ;;  %v3023_v17 = vld [vmem:[#allocation5 + $0x1f8] sm:$0xf0] }
  0xe8   :  { %1960 = vmatpush.bf16.msrb.mxu2 %v3402_v62  ;;  %1933 = vmatpush.bf16.msrb.mxu0 %v2858_v8  ;;  %v4181_v30 = vld [vmem:[#allocation5 + $0x414] sm:$0xf]  ;;  %v3050_v43 = vor.u32 %v4117_v28, %v3047_v29  ;;  %v3502_v62 = vor.u32 %v4234_v57, %v3501_v56  ;;  %v2958_v8 = vor.u32 %v4098_v0, %v2957_v63  ;;  %v4218_v19 = vld [vmem:[#allocation5 + $0x534] sm:$0xf0]  ;;  %v4602_v57 = vpop.f32.mrf.mxu3 }
  0xe9   :  { %v3303_v32 = vld [vmem:[#allocation5 + $0x430] sm:$0xf0]  ;;  %v3693_v21 = vld [vmem:[#allocation5 + $0x718] sm:$0xf]  ;;  %v3438_v25 = vor.u32 %v4218_v19, %v3437_v18  ;;  %v4174_v18 = vld [vmem:[#allocation5 + $0x3dc] sm:$0xf] }
  0xea   :  { %1974 = vmatpush.bf16.msrb.mxu3 %v3658_v2  ;;  %1947 = vmatpush.bf16.msrb.mxu1 %v3114_v10  ;;  %v4245_v34 = vld [vmem:[#allocation5 + $0x614] sm:$0xf]  ;;  %v3306_v44 = vor.u32 %v4181_v30, %v3303_v32  ;;  %v3758_v2 = vor.u32 %v4298_v59, %v3757_v58  ;;  %v3214_v10 = vor.u32 %v4162_v3, %v3213_v1  ;;  %v4282_v22 = vld [vmem:[#allocation5 + $0x734] sm:$0xf0]  ;;  %v4606_v14 = vpop.f32.mrf.mxu1 }
  0xeb   :  { %v3559_v35 = vld [vmem:[#allocation5 + $0x630] sm:$0xf0]  ;;  %v3149_v28 = vld [vmem:[#allocation5 + $0x2d8] sm:$0xf]  ;;  %v3694_v29 = vor.u32 %v4282_v22, %v3693_v21  ;;  %v3279_v21 = vld [vmem:[#allocation5 + $0x3f8] sm:$0xf0] }
  0xec   :  { %1961 = vmatpush.bf16.msrb.mxu2 %v3370_v11  ;;  %1934 = vmatpush.bf16.msrb.mxu0 %v2826_v23  ;;  %v3562_v47 = vor.u32 %v4245_v34, %v3559_v35  ;;  %v3470_v11 = vor.u32 %v4226_v5, %v3469_v4  ;;  %v2926_v23 = vor.u32 %v4090_v13, %v2925_v12  ;;  %v4146_v30 = vld [vmem:[#allocation5 + $0x2f4] sm:$0xf0]  ;;  %v4238_v22 = vld [vmem:[#allocation5 + $0x5dc] sm:$0xf] }
  0xed   :  { %v4210_v32 = vld [vmem:[#allocation5 + $0x4f4] sm:$0xf0] }
  0xee   :  { %1975 = vmatpush.bf16.msrb.mxu3 %v3626_v15  ;;  %1948 = vmatpush.bf16.msrb.mxu1 %v3082_v26  ;;  %v3726_v15 = vor.u32 %v4290_v7, %v3725_v6  ;;  %v2893_v26 = vld [vmem:[#allocation5 + $0xd8] sm:$0xf] }
  0xef   :  { %v3661_v34 = vld [vmem:[#allocation5 + $0x6d8] sm:$0xf] }
  0xf0   :  { %1962 = vmatpush.bf16.msrb.mxu2 %v3338_v27  ;;  %1935 = vmatpush.bf16.msrb.mxu0 %v2794_v39  ;;  %v4082_v27 = vld [vmem:[#allocation5 + $0xf4] sm:$0xf0]  ;;  %v3150_v39 = vor.u32 %v4146_v30, %v3149_v28  ;;  %v4608_v30 = vpop.f32.mrf.mxu2 }
  0xf1   :  { %v4274_v35 = vld [vmem:[#allocation5 + $0x6f4] sm:$0xf0]  ;;  %v2894_v37 = vor.u32 %v4082_v27, %v2893_v26  ;;  %v4302_v26 = vld [vmem:[#allocation5 + $0x7dc] sm:$0xf] }
  0xf2   :  { %1976 = vmatpush.bf16.msrb.mxu3 %v3594_v31  ;;  %1949 = vmatpush.bf16.msrb.mxu1 %v3050_v43  ;;  %v3405_v31 = vld [vmem:[#allocation5 + $0x4d8] sm:$0xf]  ;;  %v3791_v27 = vld [vmem:[#allocation5 + $0x7f8] sm:$0xf0] }
  0xf3   :  { %1936 = vmatmul.bf16.vlgmr.msrb.gmra.mxu0 %v4566_v16  ;;  %v3406_v40 = vor.u32 %v4210_v32, %v3405_v31  ;;  %v2861_v41 = vld [vmem:[#allocation5 + $0x98] sm:$0xf]  ;;  %v3282_v31 = vor.u32 %v4174_v18, %v3279_v21  ;;  %v2895_v21 = vld [vmem:[#allocation5 + $0xf8] sm:$0xf0] }
  0xf4   :  { %1963 = vmatpush.bf16.msrb.mxu2 %v3306_v44  ;;  %1984 = vmatpush.bf16.msra.mxu0 %v3022_v48  ;;  %v4074_v42 = vld [vmem:[#allocation5 + $0xb4] sm:$0xf0]  ;;  %v3662_v44 = vor.u32 %v4274_v35, %v3661_v34  ;;  %v4102_v34 = vld [vmem:[#allocation5 + $0x19c] sm:$0xf] }
  0xf5   :  { %1950 = vmatmul.bf16.vlgmr.msrb.gmra.mxu1 %v4572_v33  ;;  %v3117_v43 = vld [vmem:[#allocation5 + $0x298] sm:$0xf]  ;;  %v2991_v35 = vld [vmem:[#allocation5 + $0x1b8] sm:$0xf0] }
  0xf6   :  { %1977 = vmatpush.bf16.msrb.mxu3 %v3562_v47  ;;  %1998 = vmatpush.bf16.msra.mxu1 %v3278_v49  ;;  %v4138_v45 = vld [vmem:[#allocation5 + $0x2b4] sm:$0xf0] }
  0xf7   :  { %1964 = vmatmul.bf16.vlgmr.msrb.gmra.mxu2 %v4564_v9  ;;  %v3373_v46 = vld [vmem:[#allocation5 + $0x498] sm:$0xf]  ;;  %v3118_v52 = vor.u32 %v4138_v45, %v3117_v43  ;;  %v3503_v43 = vld [vmem:[#allocation5 + $0x5b8] sm:$0xf0] }
  0xf8   :  { %2012 = vmatpush.bf16.msra.mxu2 %v3534_v50  ;;  %1985 = vmatpush.bf16.msra.mxu0 %v2990_v60  ;;  %v4202_v47 = vld [vmem:[#allocation5 + $0x4b4] sm:$0xf0]  ;;  %v2862_v50 = vor.u32 %v4074_v42, %v2861_v41  ;;  %v3247_v41 = vld [vmem:[#allocation5 + $0x3b8] sm:$0xf0] }
  0xf9   :  { %1978 = vmatmul.bf16.vlgmr.msrb.gmra.mxu3 %v4569_v20  ;;  %v3629_v48 = vld [vmem:[#allocation5 + $0x698] sm:$0xf]  ;;  %v3374_v53 = vor.u32 %v4202_v47, %v3373_v46  ;;  %v4230_v42 = vld [vmem:[#allocation5 + $0x59c] sm:$0xf]  ;;  %v2994_v47 = vor.u32 %v4102_v34, %v2991_v35 }
  0xfa   :  { %2026 = vmatpush.bf16.msra.mxu3 %v3790_v54  ;;  %1999 = vmatpush.bf16.msra.mxu1 %v3246_v61  ;;  %v4266_v49 = vld [vmem:[#allocation5 + $0x6b4] sm:$0xf0]  ;;  %v3759_v45 = vld [vmem:[#allocation5 + $0x7b8] sm:$0xf0] }
  0xfb   :  { %v2829_v54 = vld [vmem:[#allocation5 + $0x58] sm:$0xf]  ;;  %v3630_v58 = vor.u32 %v4266_v49, %v3629_v48  ;;  %v3506_v49 = vor.u32 %v4230_v42, %v3503_v43  ;;  %v3119_v43 = vld [vmem:[#allocation5 + $0x2b8] sm:$0xf0] }
  0xfc   :  { %2013 = vmatpush.bf16.msra.mxu2 %v3502_v62  ;;  %1986 = vmatpush.bf16.msra.mxu0 %v2958_v8  ;;  %v4066_v55 = vld [vmem:[#allocation5 + $0x74] sm:$0xf0]  ;;  %v4604_v8 = vpop.f32.mrf.mxu0 }
  0xfd   :  { %v3085_v56 = vld [vmem:[#allocation5 + $0x258] sm:$0xf]  ;;  %v2830_v0 = vor.u32 %v4066_v55, %v2829_v54  ;;  %v4158_v54 = vld [vmem:[#allocation5 + $0x35c] sm:$0xf] }
  0xfe   :  { %2027 = vmatpush.bf16.msra.mxu3 %v3758_v2  ;;  %2000 = vmatpush.bf16.msra.mxu1 %v3214_v10  ;;  %v4130_v59 = vld [vmem:[#allocation5 + $0x274] sm:$0xf0] }
  0xff   :  { %v3341_v60 = vld [vmem:[#allocation5 + $0x458] sm:$0xf]  ;;  %v3086_v3 = vor.u32 %v4130_v59, %v3085_v56  ;;  %v3215_v56 = vld [vmem:[#allocation5 + $0x378] sm:$0xf0] }
 0x100   :  { %2014 = vmatpush.bf16.msra.mxu2 %v3470_v11  ;;  %1987 = vmatpush.bf16.msra.mxu0 %v2926_v23  ;;  %v4194_v61 = vld [vmem:[#allocation5 + $0x474] sm:$0xf0]  ;;  %v3535_v23 = vld [vmem:[#allocation5 + $0x5f8] sm:$0xf0] }
 0x101   :  { %v3597_v62 = vld [vmem:[#allocation5 + $0x658] sm:$0xf]  ;;  %v3342_v4 = vor.u32 %v4194_v61, %v3341_v60  ;;  %v3538_v32 = vor.u32 %v4238_v22, %v3535_v23  ;;  %v3471_v59 = vld [vmem:[#allocation5 + $0x578] sm:$0xf0] }
 0x102   :  { %2028 = vmatpush.bf16.msra.mxu3 %v3726_v15  ;;  %2001 = vmatpush.bf16.msra.mxu1 %v3182_v24  ;;  %v4258_v63 = vld [vmem:[#allocation5 + $0x674] sm:$0xf0]  ;;  %v4110_v15 = vld [vmem:[#allocation5 + $0x1dc] sm:$0xf] }
 0x103   :  { %v2797_v1 = vld [vmem:[#allocation5 + $0x18] sm:$0xf]  ;;  %v3598_v10 = vor.u32 %v4258_v63, %v3597_v62  ;;  %v4286_v60 = vld [vmem:[#allocation5 + $0x75c] sm:$0xf]  ;;  %v4620_v63 = vpop.f32.mrf.mxu2 }
 0x104   :  { %2015 = vmatpush.bf16.msra.mxu2 %v3438_v25  ;;  %1988 = vmatpush.bf16.msra.mxu0 %v2894_v37  ;;  %v4058_v2 = vld [vmem:[#allocation5 + $0x34] sm:$0xf0]  ;;  %v4166_v37 = vld [vmem:[#allocation5 + $0x39c] sm:$0xf]  ;;  %v4612_v46 = vpop.f32.mrf.mxu0 }
 0x105   :  { %v3053_v5 = vld [vmem:[#allocation5 + $0x218] sm:$0xf]  ;;  %v2798_v19 = vor.u32 %v4058_v2, %v2797_v1  ;;  %v3250_v48 = vor.u32 %v4166_v37, %v3247_v41  ;;  %v3727_v61 = vld [vmem:[#allocation5 + $0x778] sm:$0xf0] }
 0x106   :  { %2029 = vmatpush.bf16.msra.mxu3 %v3694_v29  ;;  %2002 = vmatpush.bf16.msra.mxu1 %v3150_v39  ;;  %v4122_v6 = vld [vmem:[#allocation5 + $0x234] sm:$0xf0]  ;;  %v3026_v29 = vor.u32 %v4110_v15, %v3023_v17  ;;  %v4610_v39 = vpop.f32.mrf.mxu3  ;;  %v4086_v2 = vld [vmem:[#allocation5 + $0x11c] sm:$0xf] }
 0x107   :  { %v3309_v7 = vld [vmem:[#allocation5 + $0x418] sm:$0xf]  ;;  %v3054_v24 = vor.u32 %v4122_v6, %v3053_v5  ;;  %v3730_v5 = vor.u32 %v4286_v60, %v3727_v61  ;;  %v4142_v22 = vld [vmem:[#allocation5 + $0x2dc] sm:$0xf] }
 0x108   :  { %2016 = vmatpush.bf16.msra.mxu2 %v3406_v40  ;;  %1989 = vmatpush.bf16.msra.mxu0 %v2862_v50  ;;  %v4186_v11 = vld [vmem:[#allocation5 + $0x434] sm:$0xf0]  ;;  %v3794_v40 = vor.u32 %v4302_v26, %v3791_v27  ;;  %v4614_v50 = vpop.f32.mrf.mxu1  ;;  %v4206_v26 = vld [vmem:[#allocation5 + $0x4dc] sm:$0xf] }
 0x109   :  { %v3565_v12 = vld [vmem:[#allocation5 + $0x618] sm:$0xf]  ;;  %v3310_v25 = vor.u32 %v4186_v11, %v3309_v7  ;;  %v3183_v7 = vld [vmem:[#allocation5 + $0x338] sm:$0xf0] }
 0x10a   :  { %2030 = vmatpush.bf16.msra.mxu3 %v3662_v44  ;;  %2003 = vmatpush.bf16.msra.mxu1 %v3118_v52  ;;  %v4250_v13 = vld [vmem:[#allocation5 + $0x634] sm:$0xf0]  ;;  %v4294_v44 = vld [vmem:[#allocation5 + $0x79c] sm:$0xf] }
 0x10b   :  { %v3566_v28 = vor.u32 %v4250_v13, %v3565_v12  ;;  %v4094_v52 = vld [vmem:[#allocation5 + $0x15c] sm:$0xf]  ;;  %v3762_v55 = vor.u32 %v4294_v44, %v3759_v45 }
 0x10c   :  { %2017 = vmatpush.bf16.msra.mxu2 %v3374_v53  ;;  %1990 = vmatpush.bf16.msra.mxu0 %v2830_v0  ;;  %v2959_v53 = vld [vmem:[#allocation5 + $0x178] sm:$0xf0]  ;;  %v3218_v0 = vor.u32 %v4158_v54, %v3215_v56  ;;  %v4624_v23 = vpop.f32.mrf.mxu0 }
 0x10d   :  { %v2962_v62 = vor.u32 %v4094_v52, %v2959_v53  ;;  %v3439_v11 = vld [vmem:[#allocation5 + $0x538] sm:$0xf0] }
 0x10e   :  { %2031 = vmatpush.bf16.msra.mxu3 %v3630_v58  ;;  %2004 = vmatpush.bf16.msra.mxu1 %v3086_v3  ;;  %v4222_v58 = vld [vmem:[#allocation5 + $0x55c] sm:$0xf]  ;;  %v4622_v6 = vpop.f32.mrf.mxu3 }
 0x10f   :  { %v3474_v1 = vor.u32 %v4222_v58, %v3471_v59  ;;  %v2927_v3 = vld [vmem:[#allocation5 + $0x138] sm:$0xf0] }
 0x110   :  { %2018 = vmatpush.bf16.msra.mxu2 %v3342_v4  ;;  %1991 = vmatpush.bf16.msra.mxu0 %v2798_v19  ;;  %v4150_v4 = vld [vmem:[#allocation5 + $0x31c] sm:$0xf]  ;;  %v2930_v15 = vor.u32 %v4086_v2, %v2927_v3 }
 0x111   :  { %v4278_v12 = vld [vmem:[#allocation5 + $0x71c] sm:$0xf]  ;;  %v3186_v17 = vor.u32 %v4150_v4, %v3183_v7 }
 0x112   :  { %2032 = vmatpush.bf16.msra.mxu3 %v3598_v10  ;;  %2005 = vmatpush.bf16.msra.mxu1 %v3054_v24  ;;  %v4214_v10 = vld [vmem:[#allocation5 + $0x51c] sm:$0xf] }
 0x113   :  { %1992 = vmatmul.bf16.vlgmr.msra.gmra.mxu0 %v4566_v16  ;;  %v3695_v13 = vld [vmem:[#allocation5 + $0x738] sm:$0xf0]  ;;  %v3442_v18 = vor.u32 %v4214_v10, %v3439_v11 }
 0x114   :  { %2019 = vmatpush.bf16.msra.mxu2 %v3310_v25  ;;  %2040 = vmatpush.bf16.msrb.mxu0 %v3026_v29  ;;  %v4078_v19 = vld [vmem:[#allocation5 + $0xdc] sm:$0xf]  ;;  %v3698_v24 = vor.u32 %v4278_v12, %v3695_v13 }
 0x115   :  { %2006 = vmatmul.bf16.vlgmr.msra.gmra.mxu1 %v4572_v33  ;;  %v3151_v25 = vld [vmem:[#allocation5 + $0x2f8] sm:$0xf0] }
 0x116   :  { %2033 = vmatpush.bf16.msra.mxu3 %v3566_v28  ;;  %2054 = vmatpush.bf16.msrb.mxu1 %v3282_v31  ;;  %v3407_v27 = vld [vmem:[#allocation5 + $0x4f8] sm:$0xf0]  ;;  %v4626_v28 = vpop.f32.mrf.mxu1  ;;  %v3154_v34 = vor.u32 %v4142_v22, %v3151_v25  ;;  %v4630_v52 = vpop.f32.mrf.mxu3 }
 0x117   :  { %2020 = vmatmul.bf16.vlgmr.msra.gmra.mxu2 %v4564_v9  ;;  %v4270_v29 = vld [vmem:[#allocation5 + $0x6dc] sm:$0xf]  ;;  %v3410_v35 = vor.u32 %v4206_v26, %v3407_v27 }
 0x118   :  { %2068 = vmatpush.bf16.msrb.mxu2 %v3538_v32  ;;  %2041 = vmatpush.bf16.msrb.mxu0 %v2994_v47  ;;  %v3663_v31 = vld [vmem:[#allocation5 + $0x6f8] sm:$0xf0]  ;;  %v2898_v32 = vor.u32 %v4078_v19, %v2895_v21  ;;  %v4628_v47 = vpop.f32.mrf.mxu2 }
 0x119   :  { %2034 = vmatmul.bf16.vlgmr.msra.gmra.mxu3 %v4569_v20  ;;  %v4070_v37 = vld [vmem:[#allocation5 + $0x9c] sm:$0xf]  ;;  %v3666_v42 = vor.u32 %v4270_v29, %v3663_v31 }
 0x11a   :  { %2082 = vmatpush.bf16.msrb.mxu3 %v3794_v40  ;;  %2055 = vmatpush.bf16.msrb.mxu1 %v3250_v48  ;;  %v2863_v40 = vld [vmem:[#allocation5 + $0xb8] sm:$0xf0] }
 0x11b   :  { %v4134_v41 = vld [vmem:[#allocation5 + $0x29c] sm:$0xf]  ;;  %v2866_v53 = vor.u32 %v4070_v37, %v2863_v40 }
 0x11c   :  { %2069 = vmatpush.bf16.msrb.mxu2 %v3506_v49  ;;  %2042 = vmatpush.bf16.msrb.mxu0 %v2962_v62  ;;  %v4198_v44 = vld [vmem:[#allocation5 + $0x49c] sm:$0xf]  ;;  %v3122_v54 = vor.u32 %v4134_v41, %v3119_v43  ;;  %v4338_v41 = vld [vmem:[#allocation8 + $0xf8] sm:$0xff] }
 0x11d   :  { %v3375_v45 = vld [vmem:[#allocation5 + $0x4b8] sm:$0xf0]  ;;  %v4640_v43 = vld [vmem:[#allocation7] sm:$0xff] }
 0x11e   :  { %2083 = vmatpush.bf16.msrb.mxu3 %v3762_v55  ;;  %2056 = vmatpush.bf16.msrb.mxu1 %v3218_v0  ;;  %v4262_v48 = vld [vmem:[#allocation5 + $0x69c] sm:$0xf]  ;;  %v3378_v55 = vor.u32 %v4198_v44, %v3375_v45  ;;  %v4634_v4 = vpop.f32.mrf.mxu1  ;;  %v4638_v26 = vpop.f32.mrf.mxu3 }
 0x11f   :  { %v3631_v49 = vld [vmem:[#allocation5 + $0x6b8] sm:$0xf0] }
 0x120   :  { %2070 = vmatpush.bf16.msrb.mxu2 %v3474_v1  ;;  %2043 = vmatpush.bf16.msrb.mxu0 %v2930_v15  ;;  %v4062_v56 = vld [vmem:[#allocation5 + $0x5c] sm:$0xf]  ;;  %v3634_v60 = vor.u32 %v4262_v48, %v3631_v49  ;;  %v4632_v1 = vpop.f32.mrf.mxu0  ;;  %v352_v49 = vperm.slane %v4640_v43, 0 }
 0x121   :  { %v2831_v58 = vld [vmem:[#allocation5 + $0x78] sm:$0xf0] }
 0x122   :  { %2084 = vmatpush.bf16.msrb.mxu3 %v3730_v5  ;;  %2057 = vmatpush.bf16.msrb.mxu1 %v3186_v17  ;;  %v4126_v59 = vld [vmem:[#allocation5 + $0x25c] sm:$0xf]  ;;  %v2834_v5 = vor.u32 %v4062_v56, %v2831_v58  ;;  %v353_v56 = vperm.slane %v4640_v43, 1  ;;  %v4336_v58 = vld [vmem:[#allocation8 + $0xe8] sm:$0xff] }
 0x123   :  { %v3087_v61 = vld [vmem:[#allocation5 + $0x278] sm:$0xf0] }
 0x124   :  { %2071 = vmatpush.bf16.msrb.mxu2 %v3442_v18  ;;  %2044 = vmatpush.bf16.msrb.mxu0 %v2898_v32  ;;  %v4190_v62 = vld [vmem:[#allocation5 + $0x45c] sm:$0xf]  ;;  %v3090_v7 = vor.u32 %v4126_v59, %v3087_v61  ;;  %v4314_v32 = vld [vmem:[#allocation8 + $0x38] sm:$0xff]  ;;  %v4311_v59 = vld [vmem:[#allocation8 + $0x20] sm:$0xff] }
 0x125   :  { %v3343_v0 = vld [vmem:[#allocation5 + $0x478] sm:$0xf0] }
 0x126   :  { %2085 = vmatpush.bf16.msrb.mxu3 %v3698_v24  ;;  %2058 = vmatpush.bf16.msrb.mxu1 %v3154_v34  ;;  %v4254_v2 = vld [vmem:[#allocation5 + $0x65c] sm:$0xf]  ;;  %v3346_v10 = vor.u32 %v4190_v62, %v3343_v0  ;;  %v4636_v24 = vpop.f32.mrf.mxu2  ;;  %v4322_v34 = vld [vmem:[#allocation8 + $0x78] sm:$0xff]  ;;  %v1785_v40 = vpop.f32.mrf.mxu1  ;;  %v1660_v62 = vadd.f32 %v4604_v8, %v352_v49  ;;  %v1714_v0 = vadd.f32 %v4612_v46, %v353_v56 }
 0x127   :  { %v3599_v3 = vld [vmem:[#allocation5 + $0x678] sm:$0xf0] }
 0x128   :  { %2072 = vmatpush.bf16.msrb.mxu2 %v3410_v35  ;;  %2045 = vmatpush.bf16.msrb.mxu0 %v2866_v53  ;;  %v4054_v11 = vld [vmem:[#allocation5 + $0x1c] sm:$0xf]  ;;  %v3602_v15 = vor.u32 %v4254_v2, %v3599_v3  ;;  %v4330_v35 = vld [vmem:[#allocation8 + $0xb8] sm:$0xff]  ;;  %v1771_v37 = vpop.f32.mrf.mxu0  ;;  %v4319_v2 = vld [vmem:[#allocation8 + $0x60] sm:$0xff]  ;;  %v1674_v8 = vadd.f32 %v4606_v14, %v1660_v62  ;;  %v1728_v46 = vadd.f32 %v4614_v50, %v1714_v0 }
 0x129   :  { %v2799_v12 = vld [vmem:[#allocation5 + $0x38] sm:$0xf0]  ;;  %v4327_v3 = vld [vmem:[#allocation8 + $0xa0] sm:$0xff]  ;;  %v4346_v62 = vld [vmem:[#allocation8 + $0x138] sm:$0xff] }
 0x12a   :  { %2086 = vmatpush.bf16.msrb.mxu3 %v3666_v42  ;;  %2059 = vmatpush.bf16.msrb.mxu1 %v3122_v54  ;;  %v4118_v13 = vld [vmem:[#allocation5 + $0x21c] sm:$0xf]  ;;  %v2802_v25 = vor.u32 %v4054_v11, %v2799_v12  ;;  %v4312_v54 = vld [vmem:[#allocation8 + $0x28] sm:$0xff]  ;;  %v1688_v50 = vadd.f32 %v4608_v30, %v1674_v8  ;;  %v356_v8 = vperm.slane %v4640_v43, 4 }
 0x12b   :  { %v3055_v17 = vld [vmem:[#allocation5 + $0x238] sm:$0xf0]  ;;  %v4308_v30 = vld [vmem:[#allocation8 + $0x8] sm:$0xff] }
 0x12c   :  { %2073 = vmatpush.bf16.msrb.mxu2 %v3378_v55  ;;  %v4182_v18 = vld [vmem:[#allocation5 + $0x41c] sm:$0xf]  ;;  %2046 = vmatpush.bf16.msrb.mxu0 %v2834_v5  ;;  %v3058_v27 = vor.u32 %v4118_v13, %v3055_v17  ;;  %v4649_v55 = vpop.f32.mrf.mxu3  ;;  %v4335_v13 = vld [vmem:[#allocation8 + $0xe0] sm:$0xff]  ;;  %v4318_v17 = vld [vmem:[#allocation8 + $0x58] sm:$0xff] }
 0x12d   :  { %v3311_v19 = vld [vmem:[#allocation5 + $0x438] sm:$0xf0] }
 0x12e   :  { %2087 = vmatpush.bf16.msrb.mxu3 %v3634_v60  ;;  %v4246_v21 = vld [vmem:[#allocation5 + $0x61c] sm:$0xf]  ;;  %2060 = vmatpush.bf16.msrb.mxu1 %v3090_v7  ;;  %v3314_v29 = vor.u32 %v4182_v18, %v3311_v19  ;;  %v4646_v48 = vpop.f32.mrf.mxu2  ;;  %v355_v60 = vperm.slane %v4640_v43, 3  ;;  %v1716_v7 = vadd.f32 %v4624_v23, %v353_v56  ;;  %v4326_v18 = vld [vmem:[#allocation8 + $0x98] sm:$0xff] }
 0x12f   :  { %v3567_v22 = vld [vmem:[#allocation5 + $0x638] sm:$0xf0] }
 0x130   :  { %2074 = vmatpush.bf16.msrb.mxu2 %v3346_v10  ;;  %v3570_v31 = vor.u32 %v4246_v21, %v3567_v22  ;;  %2047 = vmatpush.bf16.msrb.mxu0 %v2802_v25  ;;  %v4313_v42 = vld [vmem:[#allocation8 + $0x30] sm:$0xff]  ;;  %v1825_v61 = vpop.f32.mrf.mxu0  ;;  %v1730_v23 = vadd.f32 %v4626_v28, %v1716_v7 }
 0x131   :  { %v4321_v44 = vld [vmem:[#allocation8 + $0x70] sm:$0xff]  ;;  %v1826_v12 = vadd.f32 %v1825_v61, %v355_v60 }
 0x132   :  { %2088 = vmatpush.bf16.msrb.mxu3 %v3602_v15  ;;  %2061 = vmatpush.bf16.msrb.mxu1 %v3058_v27  ;;  %v4329_v45 = vld [vmem:[#allocation8 + $0xb0] sm:$0xff]  ;;  %v1839_v5 = vpop.f32.mrf.mxu1  ;;  %v4310_v15 = vld [vmem:[#allocation8 + $0x18] sm:$0xff] }
 0x133   :  { %2048 = vmatmul.bf16.vlgmr.msrb.gmra.mxu0 %v4566_v16  ;;  %v4337_v53 = vld [vmem:[#allocation8 + $0xf0] sm:$0xff]  ;;  %v4320_v16 = vld [vmem:[#allocation8 + $0x68] sm:$0xff]  ;;  %v1840_v25 = vadd.f32 %v1839_v5, %v1826_v12  ;;  %v4334_v27 = vld [vmem:[#allocation8 + $0xd8] sm:$0xff] }
 0x134   :  { %2075 = vmatpush.bf16.msrb.mxu2 %v3314_v29  ;;  %2636 = vmatpush.bf16.msra.mxu0 %v4314_v32  ;;  %v4309_v14 = vld [vmem:[#allocation8 + $0x10] sm:$0xff]  ;;  %v4331_v5 = vld [vmem:[#allocation8 + $0xc0] sm:$0xff] }
 0x135   :  { %2062 = vmatmul.bf16.vlgmr.msrb.gmra.mxu1 %v4572_v33  ;;  %v4328_v33 = vld [vmem:[#allocation8 + $0xa8] sm:$0xff]  ;;  %v4317_v32 = vld [vmem:[#allocation8 + $0x50] sm:$0xff] }
 0x136   :  { %2089 = vmatpush.bf16.msrb.mxu3 %v3570_v31  ;;  %2650 = vmatpush.bf16.msra.mxu1 %v4322_v34  ;;  %v1742_v31 = vadd.f32 %v4620_v63, %v1728_v46  ;;  %v4325_v28 = vld [vmem:[#allocation8 + $0x90] sm:$0xff] }
 0x137   :  { %2076 = vmatmul.bf16.vlgmr.msrb.gmra.mxu2 %v4564_v9  ;;  %v354_v9 = vperm.slane %v4640_v43, 2 }
 0x138   :  { %2664 = vmatpush.bf16.msra.mxu2 %v4330_v35  ;;  %2637 = vmatpush.bf16.msra.mxu0 %v4313_v42  ;;  %v1827_v29 = vpop.f32.mrf.mxu0  ;;  %v1744_v35 = vadd.f32 %v4628_v47, %v1730_v23  ;;  %v4333_v42 = vld [vmem:[#allocation8 + $0xd0] sm:$0xff]  ;;  %v4324_v47 = vld [vmem:[#allocation8 + $0x88] sm:$0xff]  ;;  %v4351_v23 = vld [vmem:[#allocation8 + $0x160] sm:$0xff] }
 0x139   :  { %2090 = vmatmul.bf16.vlgmr.msrb.gmra.mxu3 %v4569_v20  ;;  %v1658_v20 = vadd.f32 %v4596_v36, %v352_v49  ;;  %v1770_v36 = vadd.f32 %v4632_v1, %v354_v9  ;;  %v1772_v10 = vadd.f32 %v1771_v37, %v354_v9  ;;  %v1828_v34 = vadd.f32 %v1827_v29, %v355_v60  ;;  %v4316_v49 = vld [vmem:[#allocation8 + $0x48] sm:$0xff]  ;;  %v4307_v9 = vld [vmem:[#allocation8] sm:$0xff]  ;;  %v4341_v29 = vld [vmem:[#allocation8 + $0x110] sm:$0xff] }
 0x13a   :  { %2678 = vmatpush.bf16.msra.mxu3 %v4338_v41  ;;  %2651 = vmatpush.bf16.msra.mxu1 %v4321_v44  ;;  %v1853_v19 = vpop.f32.mrf.mxu2  ;;  %v1702_v44 = vadd.f32 %v4610_v39, %v1688_v50  ;;  %v4332_v39 = vld [vmem:[#allocation8 + $0xc8] sm:$0xff] }
 0x13b   :  { %v1672_v11 = vadd.f32 %v4598_v38, %v1658_v20  ;;  %v1784_v1 = vadd.f32 %v4634_v4, %v1770_v36  ;;  %v1786_v21 = vadd.f32 %v1785_v40, %v1772_v10  ;;  %v1841_v4 = vpop.f32.mrf.mxu1  ;;  %v1854_v41 = vadd.f32 %v1853_v19, %v1840_v25  ;;  %v4345_v10 = vld [vmem:[#allocation8 + $0x130] sm:$0xff]  ;;  %v4350_v25 = vld [vmem:[#allocation8 + $0x158] sm:$0xff] }
 0x13c   :  { %2665 = vmatpush.bf16.msra.mxu2 %v4329_v45  ;;  %2638 = vmatpush.bf16.msra.mxu0 %v4312_v54  ;;  %v1867_v38 = vpop.f32.mrf.mxu3  ;;  %v1842_v40 = vadd.f32 %v1841_v4, %v1828_v34  ;;  %v1756_v45 = vadd.f32 %v4622_v6, %v1742_v31  ;;  %v2104_v20 = vmax.f32 %v1702_v44, 0.0  ;;  %v4340_v4 = vld [vmem:[#allocation8 + $0x108] sm:$0xff]  ;;  %v4347_v44 = vld [vmem:[#allocation8 + $0x140] sm:$0xff] }
 0x13d   :  { %v1686_v22 = vadd.f32 %v4600_v51, %v1672_v11  ;;  %v1798_v51 = vadd.f32 %v4636_v24, %v1784_v1  ;;  %v1800_v37 = vadd.f32 %v4646_v48, %v1786_v21  ;;  %v1758_v24 = vadd.f32 %v4630_v52, %v1744_v35  ;;  %v4353_v11 = vld [vmem:[#allocation8 + $0x170] sm:$0xff]  ;;  %v4342_v21 = vld [vmem:[#allocation8 + $0x118] sm:$0xff] }
 0x13e   :  { %2679 = vmatpush.bf16.msra.mxu3 %v4337_v53  ;;  %2652 = vmatpush.bf16.msra.mxu1 %v4320_v16  ;;  %v2097_v60 = vmax.f32 %v1756_v45, 0.0  ;;  %v4362_v45 = vld [vmem:[#allocation8 + $0x1b8] sm:$0xff] }
 0x13f   :  { %v1700_v63 = vadd.f32 %v4602_v57, %v1686_v22  ;;  %v1812_v48 = vadd.f32 %v4638_v26, %v1798_v51  ;;  %v1814_v54 = vadd.f32 %v4649_v55, %v1800_v37  ;;  %v2105_v52 = vmax.f32 %v1758_v24, 0.0  ;;  %v4354_v55 = vld [vmem:[#allocation8 + $0x178] sm:$0xff] }
 0x140   :  { %2666 = vmatpush.bf16.msra.mxu2 %v4328_v33  ;;  %2639 = vmatpush.bf16.msra.mxu0 %v4311_v59  ;;  %v1868_v33 = vadd.f32 %v1867_v38, %v1854_v41  ;;  %v4323_v59 = vld [vmem:[#allocation8 + $0x80] sm:$0xff]  ;;  %v357_v24 = vperm.slane %v4640_v43, 5 }
 0x141   :  { %v2096_v6 = vmax.f32 %v1700_v63, 0.0  ;;  %v2098_v61 = vmax.f32 %v1812_v48, 0.0  ;;  %v2106_v26 = vmax.f32 %v1814_v54, 0.0  ;;  %v2113_v7 = vpack.c.bf16 %v2105_v52, %v2097_v60  ;;  %v4357_v60 = vld [vmem:[#allocation8 + $0x190] sm:$0xff] }
 0x142   :  { %2680 = vmatpush.bf16.msra.mxu3 %v4336_v58  ;;  %2653 = vmatpush.bf16.msra.mxu1 %v4319_v2  ;;  %v1855_v53 = vpop.f32.mrf.mxu2  ;;  %v4315_v58 = vld [vmem:[#allocation8 + $0x40] sm:$0xff]  ;;  %v2099_v0 = vmax.f32 %v1868_v33, 0.0 }
 0x143   :  { %v1856_v56 = vadd.f32 %v1855_v53, %v1842_v40  ;;  %v2114_v36 = vpack.c.bf16 %v2106_v26, %v2098_v61  ;;  %v4348_v40 = vld [vmem:[#allocation8 + $0x148] sm:$0xff] }
 0x144   :  { %2667 = vmatpush.bf16.msra.mxu2 %v4327_v3  ;;  %2640 = vmatpush.bf16.msra.mxu0 %v4310_v15  ;;  %v1869_v16 = vpop.f32.mrf.mxu3  ;;  %v2112_v3 = vpack.c.bf16 %v2104_v20, %v2096_v6  ;;  %v4352_v15 = vld [vmem:[#allocation8 + $0x168] sm:$0xff] }
 0x145   :  { %v1870_v57 = vadd.f32 %v1869_v16, %v1856_v56  ;;  %v4360_v53 = vld [vmem:[#allocation8 + $0x1a8] sm:$0xff]  ;;  %v4359_v16 = vld [vmem:[#allocation8 + $0x1a0] sm:$0xff] }
 0x146   :  { %2681 = vmatpush.bf16.msra.mxu3 %v4335_v13  ;;  %2654 = vmatpush.bf16.msra.mxu1 %v4318_v17  ;;  %v4344_v13 = vld [vmem:[#allocation8 + $0x128] sm:$0xff]  ;;  %v4343_v17 = vld [vmem:[#allocation8 + $0x120] sm:$0xff] }
 0x147   :  { %v2107_v2 = vmax.f32 %v1870_v57, 0.0 }
 0x148   :  { %2668 = vmatpush.bf16.msra.mxu2 %v4326_v18  ;;  %2641 = vmatpush.bf16.msra.mxu0 %v4309_v14 }
 0x149   :  { %v2115_v12 = vpack.c.bf16 %v2107_v2, %v2099_v0  ;;  %v4356_v0 = vld [vmem:[#allocation8 + $0x188] sm:$0xff] }
 0x14a   :  { %2682 = vmatpush.bf16.msra.mxu3 %v4334_v27  ;;  %2655 = vmatpush.bf16.msra.mxu1 %v4317_v32  ;;  %v4349_v32 = vld [vmem:[#allocation8 + $0x150] sm:$0xff] }
 0x14c   :  { %2669 = vmatpush.bf16.msra.mxu2 %v4325_v28  ;;  %2642 = vmatpush.bf16.msra.mxu0 %v4308_v30  ;;  %v4339_v30 = vld [vmem:[#allocation8 + $0x100] sm:$0xff] }
 0x14e   :  { %2683 = vmatpush.bf16.msra.mxu3 %v4333_v42  ;;  %2656 = vmatpush.bf16.msra.mxu1 %v4316_v49 }
 0x150   :  { %2670 = vmatpush.bf16.msra.mxu2 %v4324_v47  ;;  %2643 = vmatpush.bf16.msra.mxu0 %v4307_v9  ;;  %v1881_v46 = vpop.f32.mrf.mxu0  ;;  %v4361_v47 = vld [vmem:[#allocation8 + $0x1b0] sm:$0xff]  ;;  %v4358_v9 = vld [vmem:[#allocation8 + $0x198] sm:$0xff] }
 0x151   :  { %v1882_v18 = vadd.f32 %v1881_v46, %v356_v8 }
 0x152   :  { %2684 = vmatpush.bf16.msra.mxu3 %v4332_v39  ;;  %2657 = vmatpush.bf16.msra.mxu1 %v4315_v58  ;;  %v1895_v19 = vpop.f32.mrf.mxu1 }
 0x153   :  { %2644 = vmatmul.bf16.vlgmr.msra.gmra.mxu0 %v2112_v3  ;;  %v1896_v1 = vadd.f32 %v1895_v19, %v1882_v18 }
 0x154   :  { %2671 = vmatpush.bf16.msra.mxu2 %v4323_v59  ;;  %2692 = vmatpush.bf16.msrb.mxu0 %v4346_v62 }
 0x155   :  { %2658 = vmatmul.bf16.vlgmr.msra.gmra.mxu1 %v2113_v7  ;;  %v4355_v7 = vld [vmem:[#allocation8 + $0x180] sm:$0xff] }
 0x156   :  { %2706 = vmatpush.bf16.msrb.mxu1 %v4354_v55  ;;  %2685 = vmatpush.bf16.msra.mxu3 %v4331_v5 }
 0x157   :  { %2672 = vmatmul.bf16.vlgmr.msra.gmra.mxu2 %v2114_v36  ;;  %v4370_v36 = vld [vmem:[#allocation8 + $0x1f8] sm:$0xff] }
 0x158   :  { %2693 = vmatpush.bf16.msrb.mxu0 %v4345_v10  ;;  %v1883_v14 = vpop.f32.mrf.mxu0  ;;  %2720 = vmatpush.bf16.msrb.mxu2 %v4362_v45 }
 0x159   :  { %2686 = vmatmul.bf16.vlgmr.msra.gmra.mxu3 %v2115_v12  ;;  %v1884_v50 = vadd.f32 %v1883_v14, %v356_v8  ;;  %v358_v12 = vperm.slane %v4640_v43, 6  ;;  %v4367_v8 = vld [vmem:[#allocation8 + $0x1e0] sm:$0xff] }
 0x15a   :  { %2707 = vmatpush.bf16.msrb.mxu1 %v4353_v11  ;;  %v1909_v38 = vpop.f32.mrf.mxu2  ;;  %v1897_v31 = vpop.f32.mrf.mxu1  ;;  %2734 = vmatpush.bf16.msrb.mxu3 %v4370_v36  ;;  %v4369_v11 = vld [vmem:[#allocation8 + $0x1f0] sm:$0xff] }
 0x15b   :  { %v1910_v27 = vadd.f32 %v1909_v38, %v1896_v1  ;;  %v1898_v28 = vadd.f32 %v1897_v31, %v1884_v50  ;;  %v4364_v31 = vld [vmem:[#allocation8 + $0x1c8] sm:$0xff] }
 0x15c   :  { %2694 = vmatpush.bf16.msrb.mxu0 %v4344_v13  ;;  %v1923_v22 = vpop.f32.mrf.mxu3  ;;  %2721 = vmatpush.bf16.msrb.mxu2 %v4361_v47  ;;  %v4368_v13 = vld [vmem:[#allocation8 + $0x1e8] sm:$0xff] }
 0x15d   :  { %v1924_v34 = vadd.f32 %v1923_v22, %v1910_v27  ;;  %v4365_v27 = vld [vmem:[#allocation8 + $0x1d0] sm:$0xff] }
 0x15e   :  { %2708 = vmatpush.bf16.msrb.mxu1 %v4352_v15  ;;  %2735 = vmatpush.bf16.msrb.mxu3 %v4369_v11 }
 0x15f   :  { %v2100_v41 = vmax.f32 %v1924_v34, 0.0 }
 0x160   :  { %2695 = vmatpush.bf16.msrb.mxu0 %v4343_v17  ;;  %2722 = vmatpush.bf16.msrb.mxu2 %v4360_v53 }
 0x162   :  { %2709 = vmatpush.bf16.msrb.mxu1 %v4351_v23  ;;  %v1911_v35 = vpop.f32.mrf.mxu2  ;;  %2736 = vmatpush.bf16.msrb.mxu3 %v4368_v13  ;;  %v4366_v23 = vld [vmem:[#allocation8 + $0x1d8] sm:$0xff] }
 0x163   :  { %v1912_v51 = vadd.f32 %v1911_v35, %v1898_v28  ;;  %v4363_v35 = vld [vmem:[#allocation8 + $0x1c0] sm:$0xff] }
 0x164   :  { %2696 = vmatpush.bf16.msrb.mxu0 %v4342_v21  ;;  %v1925_v37 = vpop.f32.mrf.mxu3  ;;  %2723 = vmatpush.bf16.msrb.mxu2 %v4359_v16 }
 0x165   :  { %v1926_v42 = vadd.f32 %v1925_v37, %v1912_v51 }
 0x166   :  { %2710 = vmatpush.bf16.msrb.mxu1 %v4350_v25  ;;  %2737 = vmatpush.bf16.msrb.mxu3 %v4367_v8 }
 0x167   :  { %v2108_v63 = vmax.f32 %v1926_v42, 0.0 }
 0x168   :  { %2697 = vmatpush.bf16.msrb.mxu0 %v4341_v29  ;;  %2724 = vmatpush.bf16.msrb.mxu2 %v4358_v9 }
 0x169   :  { %v2116_v49 = vpack.c.bf16 %v2108_v63, %v2100_v41 }
 0x16a   :  { %2711 = vmatpush.bf16.msrb.mxu1 %v4349_v32  ;;  %2738 = vmatpush.bf16.msrb.mxu3 %v4366_v23 }
 0x16c   :  { %2698 = vmatpush.bf16.msrb.mxu0 %v4340_v4  ;;  %2725 = vmatpush.bf16.msrb.mxu2 %v4357_v60 }
 0x16e   :  { %2712 = vmatpush.bf16.msrb.mxu1 %v4348_v40  ;;  %2739 = vmatpush.bf16.msrb.mxu3 %v4365_v27  ;;  %v359_v40 = vperm.slane %v4640_v43, 7 }
 0x170   :  { %2699 = vmatpush.bf16.msrb.mxu0 %v4339_v30  ;;  %v1937_v48 = vpop.f32.mrf.mxu0  ;;  %2726 = vmatpush.bf16.msrb.mxu2 %v4356_v0 }
 0x171   :  { %v1938_v54 = vadd.f32 %v1937_v48, %v357_v24 }
 0x172   :  { %2713 = vmatpush.bf16.msrb.mxu1 %v4347_v44  ;;  %v1951_v56 = vpop.f32.mrf.mxu1  ;;  %2740 = vmatpush.bf16.msrb.mxu3 %v4364_v31 }
 0x173   :  { %2700 = vmatmul.bf16.vlgmr.msrb.gmra.mxu0 %v2116_v49  ;;  %v1952_v33 = vadd.f32 %v1951_v56, %v1938_v54 }
 0x174   :  { %2727 = vmatpush.bf16.msrb.mxu2 %v4355_v7 }
 0x176   :  { %2741 = vmatpush.bf16.msrb.mxu3 %v4363_v35 }
 0x178   :  { %v1939_v20 = vpop.f32.mrf.mxu0 }
 0x179   :  { %v1940_v58 = vadd.f32 %v1939_v20, %v357_v24 }
 0x17a   :  { %v1965_v57 = vpop.f32.mrf.mxu2  ;;  %v1953_v59 = vpop.f32.mrf.mxu1 }
 0x17b   :  { %v1966_v6 = vadd.f32 %v1965_v57, %v1952_v33  ;;  %v1954_v52 = vadd.f32 %v1953_v59, %v1940_v58  ;;  %v4382_v59 = vld [vmem:[%s4690_s4] ss:$0 sm:$0xff]  ;;  %s4519_s4 = smov [#allocation10]  }
 0x17c   :  { %v1979_v39 = vpop.f32.mrf.mxu3  ;;  %s2754_s15 = sshll.u32 %s4519_s4, 4  ;;  %s2755_s15 = int_to_ptr.vmem [resolvable:$true] %s2754_s15 }
 0x17d   :  { %v1980_v61 = vadd.f32 %v1979_v39, %v1966_v6 }
 0x17f   :  { %v2101_v2 = vmax.f32 %v1980_v61, 0.0 }
 0x182   :  { %v1967_v26 = vpop.f32.mrf.mxu2 }
 0x183   :  { %v1968_v62 = vadd.f32 %v1967_v26, %v1954_v52 }
 0x184   :  { %v1981_v55 = vpop.f32.mrf.mxu3 }
 0x185   :  { %v1982_v3 = vadd.f32 %v1981_v55, %v1968_v62 }
 0x187   :  { %v2109_v5 = vmax.f32 %v1982_v3, 0.0 }
 0x189   :  { %v2117_v10 = vpack.c.bf16 %v2109_v5, %v2101_v2 }
 0x18b   :  { %2714 = vmatmul.bf16.vlgmr.msrb.gmra.mxu1 %v2117_v10 }
 0x190   :  { %v1993_v15 = vpop.f32.mrf.mxu0 }
 0x191   :  { %v1994_v46 = vadd.f32 %v1993_v15, %v358_v12 }
 0x192   :  { %v2007_v17 = vpop.f32.mrf.mxu1 }
 0x193   :  { %v2008_v18 = vadd.f32 %v2007_v17, %v1994_v46 }
 0x198   :  { %v1995_v38 = vpop.f32.mrf.mxu0 }
 0x199   :  { %v1996_v22 = vadd.f32 %v1995_v38, %v358_v12 }
 0x19a   :  { %v2021_v19 = vpop.f32.mrf.mxu2  ;;  %v2009_v25 = vpop.f32.mrf.mxu1 }
 0x19b   :  { %v2022_v21 = vadd.f32 %v2021_v19, %v2008_v18  ;;  %v2010_v14 = vadd.f32 %v2009_v25, %v1996_v22 }
 0x19c   :  { %v2035_v1 = vpop.f32.mrf.mxu3 }
 0x19d   :  { %v2036_v29 = vadd.f32 %v2035_v1, %v2022_v21 }
 0x19f   :  { %v2102_v34 = vmax.f32 %v2036_v29, 0.0 }
 0x1a2   :  { %v2023_v50 = vpop.f32.mrf.mxu2 }
 0x1a3   :  { %v2024_v32 = vadd.f32 %v2023_v50, %v2010_v14 }
 0x1a4   :  { %v2037_v28 = vpop.f32.mrf.mxu3 }
 0x1a5   :  { %v2038_v4 = vadd.f32 %v2037_v28, %v2024_v32 }
 0x1a7   :  { %v2110_v51 = vmax.f32 %v2038_v4, 0.0 }
 0x1a9   :  { %v2118_v37 = vpack.c.bf16 %v2110_v51, %v2102_v34 }
 0x1ab   :  { %2728 = vmatmul.bf16.vlgmr.msrb.gmra.mxu2 %v2118_v37 }
 0x1b0   :  { %v2049_v41 = vpop.f32.mrf.mxu0 }
 0x1b1   :  { %v2050_v30 = vadd.f32 %v2049_v41, %v359_v40 }
 0x1b2   :  { %v2063_v42 = vpop.f32.mrf.mxu1 }
 0x1b3   :  { %v2064_v45 = vadd.f32 %v2063_v42, %v2050_v30 }
 0x1b8   :  { %v2051_v49 = vpop.f32.mrf.mxu0 }
 0x1b9   :  { %v2052_v47 = vadd.f32 %v2051_v49, %v359_v40 }
 0x1ba   :  { %v2077_v63 = vpop.f32.mrf.mxu2  ;;  %v2065_v24 = vpop.f32.mrf.mxu1 }
 0x1bb   :  { %v2078_v53 = vadd.f32 %v2077_v63, %v2064_v45  ;;  %v2066_v48 = vadd.f32 %v2065_v24, %v2052_v47 }
 0x1bc   :  { %v2091_v44 = vpop.f32.mrf.mxu3 }
 0x1bd   :  { %v2092_v56 = vadd.f32 %v2091_v44, %v2078_v53 }
 0x1bf   :  { %v2103_v39 = vmax.f32 %v2092_v56, 0.0 }
 0x1c2   :  { %v2079_v54 = vpop.f32.mrf.mxu2 }
 0x1c3   :  { %v2080_v16 = vadd.f32 %v2079_v54, %v2066_v48 }
 0x1c4   :  { %v2093_v33 = vpop.f32.mrf.mxu3 }
 0x1c5   :  { %v2094_v57 = vadd.f32 %v2093_v33, %v2080_v16 }
 0x1c7   :  { %v2111_v9 = vmax.f32 %v2094_v57, 0.0 }
 0x1c9   :  { %v2119_v6 = vpack.c.bf16 %v2111_v9, %v2103_v39 }
 0x1cb   :  { %2742 = vmatmul.bf16.vlgmr.msrb.gmra.mxu3 %v2119_v6 }
 0x1d0   :  { %v2645_v43 = vpop.f32.mrf.mxu0 }
 0x1d1   :  { %v2646_v61 = vadd.f32 %v4382_v59, %v2645_v43 }
 0x1d2   :  { %v2659_v20 = vpop.f32.mrf.mxu1 }
 0x1d3   :  { %v2660_v55 = vadd.f32 %v2659_v20, %v2646_v61 }
 0x1d8   :  { %v2647_v60 = vpop.f32.mrf.mxu0 }
 0x1d9   :  { %v2648_v3 = vadd.f32 %v4382_v59, %v2647_v60 }
 0x1da   :  { %v2673_v58 = vpop.f32.mrf.mxu2  ;;  %v2661_v26 = vpop.f32.mrf.mxu1 }
 0x1db   :  { %v2674_v0 = vadd.f32 %v2673_v58, %v2660_v55  ;;  %v2662_v11 = vadd.f32 %v2661_v26, %v2648_v3 }
 0x1dc   :  { %v2687_v52 = vpop.f32.mrf.mxu3 }
 0x1dd   :  { %v2688_v36 = vadd.f32 %v2687_v52, %v2674_v0 }
 0x1e2   :  { %v2675_v62 = vpop.f32.mrf.mxu2 }
 0x1e3   :  { %v2676_v13 = vadd.f32 %v2675_v62, %v2662_v11 }
 0x1e4   :  { %v2689_v5 = vpop.f32.mrf.mxu3 }
 0x1e5   :  { %v2690_v18 = vadd.f32 %v2689_v5, %v2676_v13 }
 0x1f0   :  { %v2701_v2 = vpop.f32.mrf.mxu0 }
 0x1f1   :  { %v2702_v12 = vadd.f32 %v2701_v2, %v2688_v36 }
 0x1f8   :  { %v2703_v46 = vpop.f32.mrf.mxu0 }
 0x1f9   :  { %v2704_v1 = vadd.f32 %v2703_v46, %v2690_v18 }
 0x208   :  { %v2715_v7 = vpop.f32.mrf.mxu1 }
 0x209   :  { %v2716_v15 = vadd.f32 %v2715_v7, %v2702_v12 }
 0x210   :  { %v2717_v23 = vpop.f32.mrf.mxu1 }
 0x211   :  { %v2718_v38 = vadd.f32 %v2717_v23, %v2704_v1 }
 0x22e   :  { %v2729_v10 = vpop.f32.mrf.mxu2 }
 0x22f   :  { %v2730_v8 = vadd.f32 %v2729_v10, %v2716_v15 }
 0x236   :  { %v2731_v21 = vpop.f32.mrf.mxu2 }
 0x237   :  { %v2732_v22 = vadd.f32 %v2731_v21, %v2718_v38 }
 0x24e   :  { %v2743_v17 = vpop.f32.mrf.mxu3 }
 0x24f   :  { %v2744_v19 = vadd.f32 %v2743_v17, %v2730_v8 }
 0x251   :  { %2748 = vst [vmem:[#allocation10] sm:$0xff] %v2744_v19 }
 0x256   :  { %v2745_v25 = vpop.f32.mrf.mxu3 }
 0x257   :  { %v2746_v27 = vadd.f32 %v2745_v25, %v2732_v22 }
 0x259   :  { %2749 = vst [vmem:[#allocation10 + $0x8] sm:$0xff] %v2746_v27 }
 0x25a   :  { %2762 = dma.vmem_to_hbm [thread:$0]  %s2755_s15, 256, %s2757_s18, [#allocation4], %s4520_s19, %s4520_s19, %s4521_s20  }
 0x25b   :  { %4509 = dma.done.wait [#allocation4], 256  }
 0x25c   :  { %4510 = vsyncadd [#allocation4], 4294967040 }
 0x25d   :  { %2767 = vsyncpa [#allocation3], 1 }
 0x25e   :  { %2768 = vsyncpa [#allocation6], 1 }
 0x25f   :  { %2769 = vsyncpa [#allocation9], 1 }
 0x260   :  { %2770 = vsyncpa [#allocation4], 1 }

</bundles_post_ra>
